<compile_context>
chip_gen: v6e
topology: v6e:2x2x1
jax: 0.10.0
libtpu: 0.0.40
codegen_flags: <defaults>
</compile_context>

<pallas_src>
import jax
import jax.numpy as jnp
from jax import lax
from jax.experimental import pallas as pl
from jax.experimental.pallas import tpu as pltpu

LANE = 128
SUBLANE_F32 = 8
SUBLANE_BF16 = 16

C1_OUT = 32      # conv1 output channels
C2_OUT = 64      # conv2 output channels
NP2 = 128        # conv2 output channels zero-padded to a full lane width


def _round_up(x, m):
    return ((x + m - 1) // m) * m


# --------------------------- conv1: tiled matmul kernel ---------------------------

def _conv1_matmul_kernel(x_ref, w_ref, b_ref, o_ref):
    # x: (TM, Kp) bf16   w: (Kp, 32) bf16   b: (1, 32) f32   o: (TM, 32) bf16
    acc = jnp.dot(x_ref[...], w_ref[...], preferred_element_type=jnp.float32)
    o_ref[...] = jnp.maximum(acc + b_ref[...], 0.0).astype(o_ref.dtype)


def conv1_matmul_bias_relu(patches, w, b, *, tile_m=4096):
    """patches:(M,Kp) bf16 @ w:(Kp,32) bf16 + b, ReLU -> (M,32) bf16 (exactly 32 ch)."""
    M, K = patches.shape
    Kw, N = w.shape
    assert K == Kw
    tm = min(tile_m, _round_up(M, SUBLANE_BF16))      # multiple of 16 (bf16 sublane pack)
    M_pad = _round_up(M, tm)
    if M_pad != M:
        patches = jnp.pad(patches, ((0, M_pad - M), (0, 0)))
    flops = 2 * M_pad * K * N
    bytes_accessed = (M_pad * K + K * N + M_pad * N) * 2 + N * 4
    out = pl.pallas_call(
        _conv1_matmul_kernel,
        out_shape=jax.ShapeDtypeStruct((M_pad, N), jnp.bfloat16),
        grid=(M_pad // tm,),
        in_specs=[
            pl.BlockSpec((tm, K), lambda i: (i, 0)),
            pl.BlockSpec((K, N), lambda i: (0, 0)),    # weights resident
            pl.BlockSpec((1, N), lambda i: (0, 0)),    # bias resident
        ],
        out_specs=pl.BlockSpec((tm, N), lambda i: (i, 0)),
        compiler_params=pltpu.CompilerParams(
            dimension_semantics=("parallel",)),        # row tiles shard across v7x's 2 TCs
        cost_estimate=pl.CostEstimate(flops=flops, transcendentals=0,
                                      bytes_accessed=bytes_accessed),
    )(patches, w, b)
    return out[:M]                                     # padded rows only saw zero inputs


# ---------------- conv2 + ReLU + global-avg-pool + head: fused kernel ----------------

def _make_conv2_pool_head_kernel(h2, w2, c1, inv_hw):
    """One grid step = one batch item.  x is the phase-split, zero-padded conv1 activation
    so every 3x3 stride-2 tap is a *contiguous* static slice (no strided loads, no im2col
    in HBM).  conv2 is done as 9 small (c1 -> 128) matmuls accumulated in f32."""

    def kernel(x_ref, w_ref, b_ref, hw_ref, hb_ref, o_ref):
        # x:(4, h2+1, w2+1, c1) bf16   w:(9, c1, 128) bf16
        # b:(1,128) f32   hw:(128,1) f32   hb:(1,1) f32   o:(1,1,1) f32
        planes = [x_ref[p] for p in range(4)]            # load the 4 stride phases once
        acc = jnp.zeros((h2 * w2, NP2), jnp.float32)
        for di in range(3):
            for dj in range(3):
                plane = planes[(di % 2) * 2 + (dj % 2)]
                tap = plane[di // 2: di // 2 + h2, dj // 2: dj // 2 + w2, :]
                acc = acc + jnp.dot(tap.reshape(h2 * w2, c1), w_ref[di * 3 + dj],
                                    preferred_element_type=jnp.float32)
        y = jnp.maximum(acc + b_ref[...], 0.0)            # conv2 bias + ReLU (f32)
        pooled = jnp.sum(y, axis=0, keepdims=True) * inv_hw   # global average pool (1,128)
        logit = jnp.dot(pooled, hw_ref[...],
                        preferred_element_type=jnp.float32) + hb_ref[...]
        o_ref[...] = logit.reshape(1, 1, 1)

    return kernel


def conv2_pool_head(hp4, w2_taps, b2, head_w, head_b, h2, w2):
    """hp4:(B*4, h2+1, w2+1, C1) bf16 phase-split padded activation. Returns (B,1) f32."""
    B4, hph, wph, c1 = hp4.shape
    assert B4 % 4 == 0
    B = B4 // 4
    kernel = _make_conv2_pool_head_kernel(h2, w2, c1, 1.0 / float(h2 * w2))
    flops = 2 * B * h2 * w2 * (9 * c1) * NP2
    bytes_accessed = hp4.size * 2 + w2_taps.size * 2 + (b2.size + head_w.size) * 4 + B * 4
    out = pl.pallas_call(
        kernel,
        out_shape=jax.ShapeDtypeStruct((B, 1, 1), jnp.float32),
        grid=(B,),
        in_specs=[
            pl.BlockSpec((4, hph, wph, c1), lambda b: (b, 0, 0, 0)),  # one batch item
            pl.BlockSpec((9, c1, NP2), lambda b: (0, 0, 0)),          # conv2 taps resident
            pl.BlockSpec((1, NP2), lambda b: (0, 0)),                 # conv2 bias
            pl.BlockSpec((NP2, 1), lambda b: (0, 0)),                 # head weight
            pl.BlockSpec((1, 1), lambda b: (0, 0)),                   # head bias
        ],
        out_specs=pl.BlockSpec((1, 1, 1), lambda b: (b, 0, 0)),
        compiler_params=pltpu.CompilerParams(
            dimension_semantics=("parallel",)),   # batch items shard across v7x's 2 TCs
        cost_estimate=pl.CostEstimate(flops=flops, transcendentals=0,
                                      bytes_accessed=bytes_accessed),
    )(hp4, w2_taps, b2, head_w, head_b)
    return out.reshape(B, 1)


# --------------------------------- JAX glue ----------------------------------------

def _im2col_nhwc(x, kh, kw, stride, pad):
    # TODO(synk): conv1's im2col remains XLA glue (input has only 2 channels, so the
    #             blow-up is small in absolute bytes); conv2's patches are built in-kernel.
    B, H, W, C = x.shape
    xp = jnp.pad(x, ((0, 0), (pad, pad), (pad, pad), (0, 0)))
    Ho = (H + 2 * pad - kh) // stride + 1
    Wo = (W + 2 * pad - kw) // stride + 1
    cols = []
    for i in range(kh):
        for j in range(kw):
            cols.append(xp[:, i:i + stride * Ho:stride, j:j + stride * Wo:stride, :])
    return jnp.concatenate(cols, axis=-1), Ho, Wo        # feature order (kh, kw, C)


def _prep_conv1_weight(w_oihw, b):
    # [O,C,kh,kw] -> [K,(=kh*kw*C in (kh,kw,C) order), O] bf16, K zero-padded to mult of 8.
    O, C, kh, kw = w_oihw.shape
    w = jnp.transpose(w_oihw, (2, 3, 1, 0)).reshape(kh * kw * C, O)
    K = kh * kw * C
    Kp = _round_up(K, SUBLANE_F32)
    w = jnp.pad(w, ((0, Kp - K), (0, 0))).astype(jnp.bfloat16)
    return w, b.reshape(1, O).astype(jnp.float32), Kp


def _prep_conv2_weights(w_oihw, b):
    # [O,C,3,3] -> per-tap weights (9, C, 128) bf16 with tap index t = di*3 + dj,
    # output channels zero-padded to 128 (exact: zero bias + zero head rows there).
    O, C, kh, kw = w_oihw.shape
    taps = jnp.transpose(w_oihw, (2, 3, 1, 0)).reshape(kh * kw, C, O)
    taps = jnp.pad(taps, ((0, 0), (0, 0), (0, NP2 - O))).astype(jnp.bfloat16)
    bp = jnp.pad(b, (0, NP2 - O)).reshape(1, NP2).astype(jnp.float32)
    return taps, bp


def _phase_split_pad(h, h2, w2):
    # h: (B, H1, W1, C) bf16 -> (B*4, h2+1, w2+1, C) bf16 where
    #   out[b*4 + pr*2 + pc, i, j, :] = pad(h, 1)[b, 2i+pr, 2j+pc, :]
    # (zero conv padding; extra trailing zero rows/cols are never read by any tap).
    B, H1, W1, C = h.shape
    Hp, Wp = 2 * (h2 + 1), 2 * (w2 + 1)
    hp = jnp.pad(h, ((0, 0), (1, Hp - H1 - 1), (1, Wp - W1 - 1), (0, 0)))
    hp = hp.reshape(B, h2 + 1, 2, w2 + 1, 2, C)
    hp = jnp.transpose(hp, (0, 2, 4, 1, 3, 5))
    return hp.reshape(B * 4, h2 + 1, w2 + 1, C)


def spectrogram_model_forward(x_nchw, params):
    # x: [B, 2, H, W] float32 (NCHW, like the PyTorch module). One NCHW->NHWC transpose.
    x = jnp.transpose(x_nchw, (0, 2, 3, 1)).astype(jnp.float32)        # (B, H, W, 2)
    B = x.shape[0]

    # ---- conv1 (3x3, s1, p1) + ReLU: tiled matmul over im2col patches, bf16 streamed ----
    w1, b1, K1p = _prep_conv1_weight(params["conv1_w"], params["conv1_b"])
    p1, Ho1, Wo1 = _im2col_nhwc(x, 3, 3, stride=1, pad=1)              # (B,H,W,18)
    K1 = p1.shape[-1]
    p1 = p1.reshape(B * Ho1 * Wo1, K1)
    if K1p != K1:
        p1 = jnp.pad(p1, ((0, 0), (0, K1p - K1)))
    p1 = p1.astype(jnp.bfloat16)
    h = conv1_matmul_bias_relu(p1, w1, b1)                             # (M, 32) bf16
    h = h.reshape(B, Ho1, Wo1, C1_OUT)                                 # NHWC, 32 ch exactly

    # ---- conv2 (3x3, s2, p1) + ReLU + global-avg-pool + head: ONE fused kernel ----
    H2 = (Ho1 - 1) // 2 + 1
    W2 = (Wo1 - 1) // 2 + 1
    hp4 = _phase_split_pad(h, H2, W2)                                  # (B*4, H2+1, W2+1, 32)
    w2t, b2 = _prep_conv2_weights(params["conv2_w"], params["conv2_b"])
    head_w = jnp.pad(params["head_w"], ((0, NP2 - C2_OUT), (0, 0))).astype(jnp.float32)
    head_b = params["head_b"].reshape(1, 1).astype(jnp.float32)
    return conv2_pool_head(hp4, w2t, b2, head_w, head_b, H2, W2)       # (B, 1)


def _reference_forward(x, params):
    # Pure-JAX f32 reference of the same stand-in network (for a loose sanity check).
    y = lax.conv_general_dilated(x, params["conv1_w"], (1, 1), ((1, 1), (1, 1)),
                                 dimension_numbers=("NCHW", "OIHW", "NCHW"))
    y = jnp.maximum(y + params["conv1_b"][None, :, None, None], 0.0)
    y = lax.conv_general_dilated(y, params["conv2_w"], (2, 2), ((1, 1), (1, 1)),
                                 dimension_numbers=("NCHW", "OIHW", "NCHW"))
    y = jnp.maximum(y + params["conv2_b"][None, :, None, None], 0.0)
    pooled = jnp.mean(y, axis=(2, 3))
    return pooled @ params["head_w"] + params["head_b"][None, :]


def init_params(key):
    k1, k2, k3, k4, k5, k6 = jax.random.split(key, 6)
    return {
        "conv1_w": 0.1 * jax.random.normal(k1, (C1_OUT, 2, 3, 3), jnp.float32),
        "conv1_b": 0.05 * jax.random.normal(k2, (C1_OUT,), jnp.float32),
        "conv2_w": 0.05 * jax.random.normal(k3, (C2_OUT, C1_OUT, 3, 3), jnp.float32),
        "conv2_b": 0.05 * jax.random.normal(k4, (C2_OUT,), jnp.float32),
        "head_w": 0.1 * jax.random.normal(k5, (C2_OUT, 1), jnp.float32),
        "head_b": 0.05 * jax.random.normal(k6, (1,), jnp.float32),
    }


if __name__ == "__main__":
    key = jax.random.PRNGKey(0)
    kx, kp = jax.random.split(key)
    # batch=2, in_chans=2 (spectrogram real/imag or stereo), spatial 16x16
    x = jax.random.normal(kx, (2, 2, 16, 16), jnp.float32)
    params = init_params(kp)

    fwd = jax.jit(spectrogram_model_forward)
    out = jax.block_until_ready(fwd(x, params))
    assert out.shape == (2, 1) and out.dtype == jnp.float32

    ref = _reference_forward(x, params)      # loose check (bf16 streaming vs f32 ref)
    assert jnp.allclose(out, ref, atol=6e-2, rtol=6e-2), (out, ref)
    print("KERNEL_OK")
</pallas_src>

<mosaic_0001>
module attributes {stable_mosaic.version = 11 : i64} {
  func.func @_conv1_matmul_kernel(%arg0: i32, %arg1: memref<512x24xbf16, #tpu.memory_space<vmem>>, %arg2: memref<24x32xbf16, #tpu.memory_space<vmem>>, %arg3: memref<1x32xf32, #tpu.memory_space<vmem>>, %arg4: memref<512x32xbf16, #tpu.memory_space<vmem>>) attributes {dimension_semantics = [#tpu.dimension_semantics<parallel>], iteration_bounds = array<i64: 1>, scalar_prefetch = 0 : i64, scratch_operands = 0 : i64, tpu.core_type = #tpu.core_type<tc>, window_params = [{transform_indices = @transform_0, window_bounds = array<i64: 512, 24>}, {pipeline_mode = #tpu.pipeline_mode<synchronous>, transform_indices = @transform_1, window_bounds = array<i64: 24, 32>}, {pipeline_mode = #tpu.pipeline_mode<synchronous>, transform_indices = @transform_2, window_bounds = array<i64: 1, 32>}, {transform_indices = @transform_3, window_bounds = array<i64: 512, 32>}]} {
    %c0 = arith.constant 0 : index
    %c0_0 = arith.constant 0 : index
    %0 = vector.load %arg1[%c0, %c0_0] : memref<512x24xbf16, #tpu.memory_space<vmem>>, vector<512x24xbf16>
    %c0_1 = arith.constant 0 : index
    %c0_2 = arith.constant 0 : index
    %1 = vector.load %arg2[%c0_1, %c0_2] : memref<24x32xbf16, #tpu.memory_space<vmem>>, vector<24x32xbf16>
    %cst = arith.constant dense<0.000000e+00> : vector<512x32xf32>
    %2 = tpu.matmul %0, %1, %cst {dimension_numbers = #tpu.dot_dimension_numbers<[1], [0], [0], [1], [0, 0, 1, 1], [], []>} : vector<512x24xbf16>, vector<24x32xbf16>, vector<512x32xf32> -> vector<512x32xf32>
    %c0_3 = arith.constant 0 : index
    %c0_4 = arith.constant 0 : index
    %3 = vector.load %arg3[%c0_3, %c0_4] : memref<1x32xf32, #tpu.memory_space<vmem>>, vector<1x32xf32>
    %4 = vector.broadcast %3 : vector<1x32xf32> to vector<512x32xf32>
    %5 = arith.addf %2, %4 : vector<512x32xf32>
    %cst_5 = arith.constant 0.000000e+00 : f32
    %6 = vector.broadcast %cst_5 : f32 to vector<512x32xf32>
    %7 = arith.maximumf %5, %6 : vector<512x32xf32>
    %8 = arith.truncf %7 : vector<512x32xf32> to vector<512x32xbf16>
    %c0_6 = arith.constant 0 : index
    %c0_7 = arith.constant 0 : index
    %9 = vector.load %arg4[%c0_6, %c0_7] : memref<512x32xbf16, #tpu.memory_space<vmem>>, vector<512x32xbf16>
    tpu.vector_store %arg4[%c0_6, %c0_7], %8 {strides = array<i32>} : memref<512x32xbf16, #tpu.memory_space<vmem>>, vector<512x32xbf16>,
    return
  }
  func.func @transform_0(%arg0: i32) -> (i32, i32) {
    %c0_i32 = arith.constant 0 : i32
    %c0_i32_0 = arith.constant 0 : i32
    return %arg0, %c0_i32 : i32, i32
  }
  func.func @transform_1(%arg0: i32) -> (i32, i32) {
    %c0_i32 = arith.constant 0 : i32
    %c0_i32_0 = arith.constant 0 : i32
    %c0_i32_1 = arith.constant 0 : i32
    return %c0_i32, %c0_i32_0 : i32, i32
  }
  func.func @transform_2(%arg0: i32) -> (i32, i32) {
    %c0_i32 = arith.constant 0 : i32
    %c0_i32_0 = arith.constant 0 : i32
    %c0_i32_1 = arith.constant 0 : i32
    return %c0_i32, %c0_i32_0 : i32, i32
  }
  func.func @transform_3(%arg0: i32) -> (i32, i32) {
    %c0_i32 = arith.constant 0 : i32
    %c0_i32_0 = arith.constant 0 : i32
    return %arg0, %c0_i32 : i32, i32
  }
}

module attributes {stable_mosaic.version = 11 : i64} {
  func.func @kernel(%arg0: i32, %arg1: memref<4x9x9x32xbf16, #tpu.memory_space<vmem>>, %arg2: memref<9x32x128xbf16, #tpu.memory_space<vmem>>, %arg3: memref<1x128xf32, #tpu.memory_space<vmem>>, %arg4: memref<128x1xf32, #tpu.memory_space<vmem>>, %arg5: memref<1x1xf32, #tpu.memory_space<vmem>>, %arg6: memref<1x1x1xf32, #tpu.memory_space<vmem>>) attributes {dimension_semantics = [#tpu.dimension_semantics<parallel>], iteration_bounds = array<i64: 2>, scalar_prefetch = 0 : i64, scratch_operands = 0 : i64, tpu.core_type = #tpu.core_type<tc>, window_params = [{transform_indices = @transform_0, window_bounds = array<i64: 4, 9, 9, 32>}, {pipeline_mode = #tpu.pipeline_mode<synchronous>, transform_indices = @transform_1, window_bounds = array<i64: 9, 32, 128>}, {pipeline_mode = #tpu.pipeline_mode<synchronous>, transform_indices = @transform_2, window_bounds = array<i64: 1, 128>}, {pipeline_mode = #tpu.pipeline_mode<synchronous>, transform_indices = @transform_3, window_bounds = array<i64: 128, 1>}, {pipeline_mode = #tpu.pipeline_mode<synchronous>, transform_indices = @transform_4, window_bounds = array<i64: 1, 1>}, {transform_indices = @transform_5, window_bounds = array<i64: 1, 1, 1>}]} {
    %c0 = arith.constant 0 : index
    %c0_0 = arith.constant 0 : index
    %c0_1 = arith.constant 0 : index
    %c0_2 = arith.constant 0 : index
    %0 = vector.load %arg1[%c0, %c0_0, %c0_1, %c0_2] : memref<4x9x9x32xbf16, #tpu.memory_space<vmem>>, vector<1x9x9x32xbf16>
    %1 = vector.shape_cast %0 : vector<1x9x9x32xbf16> to vector<9x9x32xbf16>
    %c1 = arith.constant 1 : index
    %c0_3 = arith.constant 0 : index
    %c0_4 = arith.constant 0 : index
    %c0_5 = arith.constant 0 : index
    %2 = vector.load %arg1[%c1, %c0_3, %c0_4, %c0_5] : memref<4x9x9x32xbf16, #tpu.memory_space<vmem>>, vector<1x9x9x32xbf16>
    %3 = vector.shape_cast %2 : vector<1x9x9x32xbf16> to vector<9x9x32xbf16>
    %c2 = arith.constant 2 : index
    %c0_6 = arith.constant 0 : index
    %c0_7 = arith.constant 0 : index
    %c0_8 = arith.constant 0 : index
    %4 = vector.load %arg1[%c2, %c0_6, %c0_7, %c0_8] : memref<4x9x9x32xbf16, #tpu.memory_space<vmem>>, vector<1x9x9x32xbf16>
    %5 = vector.shape_cast %4 : vector<1x9x9x32xbf16> to vector<9x9x32xbf16>
    %c3 = arith.constant 3 : index
    %c0_9 = arith.constant 0 : index
    %c0_10 = arith.constant 0 : index
    %c0_11 = arith.constant 0 : index
    %6 = vector.load %arg1[%c3, %c0_9, %c0_10, %c0_11] : memref<4x9x9x32xbf16, #tpu.memory_space<vmem>>, vector<1x9x9x32xbf16>
    %7 = vector.shape_cast %6 : vector<1x9x9x32xbf16> to vector<9x9x32xbf16>
    %cst = arith.constant 0.000000e+00 : f32
    %8 = vector.broadcast %cst : f32 to vector<64x128xf32>
    %9 = vector.extract_strided_slice %1 {offsets = [0, 0, 0], sizes = [8, 8, 32], strides = [1, 1, 1]} : vector<9x9x32xbf16> to vector<8x8x32xbf16>
    %10 = vector.shape_cast %9 : vector<8x8x32xbf16> to vector<64x32xbf16>
    %c0_12 = arith.constant 0 : index
    %c0_13 = arith.constant 0 : index
    %c0_14 = arith.constant 0 : index
    %11 = vector.load %arg2[%c0_12, %c0_13, %c0_14] : memref<9x32x128xbf16, #tpu.memory_space<vmem>>, vector<1x32x128xbf16>
    %12 = vector.shape_cast %11 : vector<1x32x128xbf16> to vector<32x128xbf16>
    %cst_15 = arith.constant dense<0.000000e+00> : vector<64x128xf32>
    %13 = tpu.matmul %10, %12, %cst_15 {dimension_numbers = #tpu.dot_dimension_numbers<[1], [0], [0], [1], [0, 0, 1, 1], [], []>} : vector<64x32xbf16>, vector<32x128xbf16>, vector<64x128xf32> -> vector<64x128xf32>
    %14 = arith.addf %8, %13 : vector<64x128xf32>
    %15 = vector.extract_strided_slice %3 {offsets = [0, 0, 0], sizes = [8, 8, 32], strides = [1, 1, 1]} : vector<9x9x32xbf16> to vector<8x8x32xbf16>
    %16 = vector.shape_cast %15 : vector<8x8x32xbf16> to vector<64x32xbf16>
    %c1_16 = arith.constant 1 : index
    %c0_17 = arith.constant 0 : index
    %c0_18 = arith.constant 0 : index
    %17 = vector.load %arg2[%c1_16, %c0_17, %c0_18] : memref<9x32x128xbf16, #tpu.memory_space<vmem>>, vector<1x32x128xbf16>
    %18 = vector.shape_cast %17 : vector<1x32x128xbf16> to vector<32x128xbf16>
    %cst_19 = arith.constant dense<0.000000e+00> : vector<64x128xf32>
    %19 = tpu.matmul %16, %18, %cst_19 {dimension_numbers = #tpu.dot_dimension_numbers<[1], [0], [0], [1], [0, 0, 1, 1], [], []>} : vector<64x32xbf16>, vector<32x128xbf16>, vector<64x128xf32> -> vector<64x128xf32>
    %20 = arith.addf %14, %19 : vector<64x128xf32>
    %21 = vector.extract_strided_slice %1 {offsets = [0, 1, 0], sizes = [8, 8, 32], strides = [1, 1, 1]} : vector<9x9x32xbf16> to vector<8x8x32xbf16>
    %22 = vector.shape_cast %21 : vector<8x8x32xbf16> to vector<64x32xbf16>
    %c2_20 = arith.constant 2 : index
    %c0_21 = arith.constant 0 : index
    %c0_22 = arith.constant 0 : index
    %23 = vector.load %arg2[%c2_20, %c0_21, %c0_22] : memref<9x32x128xbf16, #tpu.memory_space<vmem>>, vector<1x32x128xbf16>
    %24 = vector.shape_cast %23 : vector<1x32x128xbf16> to vector<32x128xbf16>
    %cst_23 = arith.constant dense<0.000000e+00> : vector<64x128xf32>
    %25 = tpu.matmul %22, %24, %cst_23 {dimension_numbers = #tpu.dot_dimension_numbers<[1], [0], [0], [1], [0, 0, 1, 1], [], []>} : vector<64x32xbf16>, vector<32x128xbf16>, vector<64x128xf32> -> vector<64x128xf32>
    %26 = arith.addf %20, %25 : vector<64x128xf32>
    %27 = vector.extract_strided_slice %5 {offsets = [0, 0, 0], sizes = [8, 8, 32], strides = [1, 1, 1]} : vector<9x9x32xbf16> to vector<8x8x32xbf16>
    %28 = vector.shape_cast %27 : vector<8x8x32xbf16> to vector<64x32xbf16>
    %c3_24 = arith.constant 3 : index
    %c0_25 = arith.constant 0 : index
    %c0_26 = arith.constant 0 : index
    %29 = vector.load %arg2[%c3_24, %c0_25, %c0_26] : memref<9x32x128xbf16, #tpu.memory_space<vmem>>, vector<1x32x128xbf16>
    %30 = vector.shape_cast %29 : vector<1x32x128xbf16> to vector<32x128xbf16>
    %cst_27 = arith.constant dense<0.000000e+00> : vector<64x128xf32>
    %31 = tpu.matmul %28, %30, %cst_27 {dimension_numbers = #tpu.dot_dimension_numbers<[1], [0], [0], [1], [0, 0, 1, 1], [], []>} : vector<64x32xbf16>, vector<32x128xbf16>, vector<64x128xf32> -> vector<64x128xf32>
    %32 = arith.addf %26, %31 : vector<64x128xf32>
    %33 = vector.extract_strided_slice %7 {offsets = [0, 0, 0], sizes = [8, 8, 32], strides = [1, 1, 1]} : vector<9x9x32xbf16> to vector<8x8x32xbf16>
    %34 = vector.shape_cast %33 : vector<8x8x32xbf16> to vector<64x32xbf16>
    %c4 = arith.constant 4 : index
    %c0_28 = arith.constant 0 : index
    %c0_29 = arith.constant 0 : index
    %35 = vector.load %arg2[%c4, %c0_28, %c0_29] : memref<9x32x128xbf16, #tpu.memory_space<vmem>>, vector<1x32x128xbf16>
    %36 = vector.shape_cast %35 : vector<1x32x128xbf16> to vector<32x128xbf16>
    %cst_30 = arith.constant dense<0.000000e+00> : vector<64x128xf32>
    %37 = tpu.matmul %34, %36, %cst_30 {dimension_numbers = #tpu.dot_dimension_numbers<[1], [0], [0], [1], [0, 0, 1, 1], [], []>} : vector<64x32xbf16>, vector<32x128xbf16>, vector<64x128xf32> -> vector<64x128xf32>
    %38 = arith.addf %32, %37 : vector<64x128xf32>
    %39 = vector.extract_strided_slice %5 {offsets = [0, 1, 0], sizes = [8, 8, 32], strides = [1, 1, 1]} : vector<9x9x32xbf16> to vector<8x8x32xbf16>
    %40 = vector.shape_cast %39 : vector<8x8x32xbf16> to vector<64x32xbf16>
    %c5 = arith.constant 5 : index
    %c0_31 = arith.constant 0 : index
    %c0_32 = arith.constant 0 : index
    %41 = vector.load %arg2[%c5, %c0_31, %c0_32] : memref<9x32x128xbf16, #tpu.memory_space<vmem>>, vector<1x32x128xbf16>
    %42 = vector.shape_cast %41 : vector<1x32x128xbf16> to vector<32x128xbf16>
    %cst_33 = arith.constant dense<0.000000e+00> : vector<64x128xf32>
    %43 = tpu.matmul %40, %42, %cst_33 {dimension_numbers = #tpu.dot_dimension_numbers<[1], [0], [0], [1], [0, 0, 1, 1], [], []>} : vector<64x32xbf16>, vector<32x128xbf16>, vector<64x128xf32> -> vector<64x128xf32>
    %44 = arith.addf %38, %43 : vector<64x128xf32>
    %45 = vector.extract_strided_slice %1 {offsets = [1, 0, 0], sizes = [8, 8, 32], strides = [1, 1, 1]} : vector<9x9x32xbf16> to vector<8x8x32xbf16>
    %46 = vector.shape_cast %45 : vector<8x8x32xbf16> to vector<64x32xbf16>
    %c6 = arith.constant 6 : index
    %c0_34 = arith.constant 0 : index
    %c0_35 = arith.constant 0 : index
    %47 = vector.load %arg2[%c6, %c0_34, %c0_35] : memref<9x32x128xbf16, #tpu.memory_space<vmem>>, vector<1x32x128xbf16>
    %48 = vector.shape_cast %47 : vector<1x32x128xbf16> to vector<32x128xbf16>
    %cst_36 = arith.constant dense<0.000000e+00> : vector<64x128xf32>
    %49 = tpu.matmul %46, %48, %cst_36 {dimension_numbers = #tpu.dot_dimension_numbers<[1], [0], [0], [1], [0, 0, 1, 1], [], []>} : vector<64x32xbf16>, vector<32x128xbf16>, vector<64x128xf32> -> vector<64x128xf32>
    %50 = arith.addf %44, %49 : vector<64x128xf32>
    %51 = vector.extract_strided_slice %3 {offsets = [1, 0, 0], sizes = [8, 8, 32], strides = [1, 1, 1]} : vector<9x9x32xbf16> to vector<8x8x32xbf16>
    %52 = vector.shape_cast %51 : vector<8x8x32xbf16> to vector<64x32xbf16>
    %c7 = arith.constant 7 : index
    %c0_37 = arith.constant 0 : index
    %c0_38 = arith.constant 0 : index
    %53 = vector.load %arg2[%c7, %c0_37, %c0_38] : memref<9x32x128xbf16, #tpu.memory_space<vmem>>, vector<1x32x128xbf16>
    %54 = vector.shape_cast %53 : vector<1x32x128xbf16> to vector<32x128xbf16>
    %cst_39 = arith.constant dense<0.000000e+00> : vector<64x128xf32>
    %55 = tpu.matmul %52, %54, %cst_39 {dimension_numbers = #tpu.dot_dimension_numbers<[1], [0], [0], [1], [0, 0, 1, 1], [], []>} : vector<64x32xbf16>, vector<32x128xbf16>, vector<64x128xf32> -> vector<64x128xf32>
    %56 = arith.addf %50, %55 : vector<64x128xf32>
    %57 = vector.extract_strided_slice %1 {offsets = [1, 1, 0], sizes = [8, 8, 32], strides = [1, 1, 1]} : vector<9x9x32xbf16> to vector<8x8x32xbf16>
    %58 = vector.shape_cast %57 : vector<8x8x32xbf16> to vector<64x32xbf16>
    %c8 = arith.constant 8 : index
    %c0_40 = arith.constant 0 : index
    %c0_41 = arith.constant 0 : index
    %59 = vector.load %arg2[%c8, %c0_40, %c0_41] : memref<9x32x128xbf16, #tpu.memory_space<vmem>>, vector<1x32x128xbf16>
    %60 = vector.shape_cast %59 : vector<1x32x128xbf16> to vector<32x128xbf16>
    %cst_42 = arith.constant dense<0.000000e+00> : vector<64x128xf32>
    %61 = tpu.matmul %58, %60, %cst_42 {dimension_numbers = #tpu.dot_dimension_numbers<[1], [0], [0], [1], [0, 0, 1, 1], [], []>} : vector<64x32xbf16>, vector<32x128xbf16>, vector<64x128xf32> -> vector<64x128xf32>
    %62 = arith.addf %56, %61 : vector<64x128xf32>
    %c0_43 = arith.constant 0 : index
    %c0_44 = arith.constant 0 : index
    %63 = vector.load %arg3[%c0_43, %c0_44] : memref<1x128xf32, #tpu.memory_space<vmem>>, vector<1x128xf32>
    %64 = vector.broadcast %63 : vector<1x128xf32> to vector<64x128xf32>
    %65 = arith.addf %62, %64 : vector<64x128xf32>
    %cst_45 = arith.constant 0.000000e+00 : f32
    %66 = vector.broadcast %cst_45 : f32 to vector<64x128xf32>
    %67 = arith.maximumf %65, %66 : vector<64x128xf32>
    %cst_46 = arith.constant dense<0.000000e+00> : vector<128xf32>
    %68 = vector.multi_reduction <add>, %67, %cst_46 [0] : vector<64x128xf32> to vector<128xf32>
    %69 = vector.shape_cast %68 : vector<128xf32> to vector<1x128xf32>
    %cst_47 = arith.constant 1.562500e-02 : f32
    %70 = vector.broadcast %cst_47 : f32 to vector<1x128xf32>
    %71 = arith.mulf %69, %70 : vector<1x128xf32>
    %c0_48 = arith.constant 0 : index
    %c0_49 = arith.constant 0 : index
    %72 = vector.load %arg4[%c0_48, %c0_49] : memref<128x1xf32, #tpu.memory_space<vmem>>, vector<128x1xf32>
    %cst_50 = arith.constant dense<0.000000e+00> : vector<1x1xf32>
    %73 = tpu.matmul %71, %72, %cst_50 {dimension_numbers = #tpu.dot_dimension_numbers<[1], [0], [0], [1], [0, 0, 1, 1], [], []>} : vector<1x128xf32>, vector<128x1xf32>, vector<1x1xf32> -> vector<1x1xf32>
    %c0_51 = arith.constant 0 : index
    %c0_52 = arith.constant 0 : index
    %74 = vector.load %arg5[%c0_51, %c0_52] : memref<1x1xf32, #tpu.memory_space<vmem>>, vector<1x1xf32>
    %75 = arith.addf %73, %74 : vector<1x1xf32>
    %76 = vector.shape_cast %75 : vector<1x1xf32> to vector<1x1x1xf32>
    %c0_53 = arith.constant 0 : index
    %c0_54 = arith.constant 0 : index
    %c0_55 = arith.constant 0 : index
    %77 = vector.load %arg6[%c0_53, %c0_54, %c0_55] : memref<1x1x1xf32, #tpu.memory_space<vmem>>, vector<1x1x1xf32>
    tpu.vector_store %arg6[%c0_53, %c0_54, %c0_55], %76 {strides = array<i32>} : memref<1x1x1xf32, #tpu.memory_space<vmem>>, vector<1x1x1xf32>,
    return
  }
  func.func @transform_0(%arg0: i32) -> (i32, i32, i32, i32) {
    %c0_i32 = arith.constant 0 : i32
    %c0_i32_0 = arith.constant 0 : i32
    %c0_i32_1 = arith.constant 0 : i32
    %c0_i32_2 = arith.constant 0 : i32
    return %arg0, %c0_i32, %c0_i32_0, %c0_i32_1 : i32, i32, i32, i32
  }
  func.func @transform_1(%arg0: i32) -> (i32, i32, i32) {
    %c0_i32 = arith.constant 0 : i32
    %c0_i32_0 = arith.constant 0 : i32
    %c0_i32_1 = arith.constant 0 : i32
    %c0_i32_2 = arith.constant 0 : i32
    return %c0_i32, %c0_i32_0, %c0_i32_1 : i32, i32, i32
  }
  func.func @transform_2(%arg0: i32) -> (i32, i32) {
    %c0_i32 = arith.constant 0 : i32
    %c0_i32_0 = arith.constant 0 : i32
    %c0_i32_1 = arith.constant 0 : i32
    return %c0_i32, %c0_i32_0 : i32, i32
  }
  func.func @transform_3(%arg0: i32) -> (i32, i32) {
    %c0_i32 = arith.constant 0 : i32
    %c0_i32_0 = arith.constant 0 : i32
    %c0_i32_1 = arith.constant 0 : i32
    return %c0_i32, %c0_i32_0 : i32, i32
  }
  func.func @transform_4(%arg0: i32) -> (i32, i32) {
    %c0_i32 = arith.constant 0 : i32
    %c0_i32_0 = arith.constant 0 : i32
    %c0_i32_1 = arith.constant 0 : i32
    return %c0_i32, %c0_i32_0 : i32, i32
  }
  func.func @transform_5(%arg0: i32) -> (i32, i32, i32) {
    %c0_i32 = arith.constant 0 : i32
    %c0_i32_0 = arith.constant 0 : i32
    %c0_i32_1 = arith.constant 0 : i32
    return %arg0, %c0_i32, %c0_i32_0 : i32, i32, i32
  }
}

</mosaic_0001>

<bundles_post_ra>
// kernel: spectrogram_model_forward.2
= control target key start
LH: loop header
LB: loop body
LE: loop exit
PB: predicated region body
PF: predicated region fallthrough
CT: control target
= control target key end

     0   :  { %vm355_vm0 = vcmask 1043456   ;;  %vm258_vm1 = vcmask 195584   ;;  %vm968_vm2 = vcmask 257024   ;;  %s1853_s1 = inlined_call_operand.vmem [shape: bf16[24,32], index: 1, kind: input, shape index: {}]   ;;  %s1854_s0 = inlined_call_operand.vmem [shape: bf16[512,24], index: 0, kind: input, shape index: {}]   ;;  %s1855_s2 = inlined_call_operand.vmem [shape: f32[1,32], index: 2, kind: input, shape index: {}]   ;;  %s1856_s3 = inlined_call_operand.vmem [shape: bf16[512,32], index: 3, kind: output, shape index: {}]  }
   0x1   :  { %v1340_v0 = vld [vmem:[%s1853_s1 + $0x8] ss:$0 sps:$4 sm:$0xff]   ;;  %v1341_v1 = vld [vmem:[%s1853_s1] sm:$0xff]   ;;  %v1346_v7 = vld [vmem:[%s1854_s0 + $0x10] sm:$0xff]  }
   0x2   :  { %1338 = vmatprep.subr.msk.bf16.mxu0 %vm355_vm0, %v1340_v0  ;;  %1339 = vmatprep.subr.msk.bf16.mxu1 %vm355_vm0, %v1340_v0  ;;  %v357_v2 = vsel %vm355_vm0, %v1340_v0, 0  ;;  %v1342_v3 = vld [vmem:[%s1854_s0] sm:$0xff]   ;;  %v1344_v5 = vld [vmem:[%s1854_s0 + $0x8] sm:$0xff]   ;;  %v1347_v8 = vld [vmem:[%s1854_s0 + $0x90] sm:$0xff]  }
   0x3   :  { %1267 = vmatpush3.bf16.msra.mxu0 %v357_v2  ;;  %1336 = vmatpush3.bf16.msra.mxu1 %v357_v2  ;;  %v1343_v4 = vld [vmem:[%s1854_s0 + $0x80] sm:$0xff]   ;;  %v1345_v6 = vld [vmem:[%s1854_s0 + $0x88] sm:$0xff]   ;;  %v1348_v9 = vld [vmem:[%s1854_s0 + $0x18] sm:$0xff]  }
   0x4   :  { %1268 = vmatprep.subr.bf16.mxu0 %v1341_v1  ;;  %1335 = vmatprep.subr.bf16.mxu1 %v1341_v1  ;;  %v1349_v10 = vld [vmem:[%s1854_s0 + $0x98] sm:$0xff]   ;;  %v1350_v11 = vld [vmem:[%s1854_s0 + $0x20] sm:$0xff]   ;;  %v1352_v13 = vld [vmem:[%s1854_s0 + $0x28] sm:$0xff]  }
   0x5   :  { %1270 = vmatprep.mubr.msk.bf16.mxu0 %vm258_vm1, %v1342_v3  ;;  %1302 = vmatprep.mubr.msk.bf16.mxu1 %vm258_vm1, %v1343_v4  ;;  %v1351_v12 = vld [vmem:[%s1854_s0 + $0xa0] sm:$0xff]   ;;  %v1353_v14 = vld [vmem:[%s1854_s0 + $0xa8] sm:$0xff]   ;;  %v1354_v15 = vld [vmem:[%s1854_s0 + $0x30] sm:$0xff]  }
   0x6   :  { %v1355_v16 = vld [vmem:[%s1854_s0 + $0xb0] sm:$0xff]   ;;  %v1356_v17 = vld [vmem:[%s1854_s0 + $0x38] sm:$0xff]   ;;  %v1358_v19 = vld [vmem:[%s1854_s0 + $0x40] sm:$0xff]  }
   0x7   :  { %1269 = vmatpush3.bf16.msra.mxu0 %v1341_v1  ;;  %1337 = vmatpush3.bf16.msra.mxu1 %v1341_v1  ;;  %v1357_v18 = vld [vmem:[%s1854_s0 + $0xb8] sm:$0xff]   ;;  %v1359_v20 = vld [vmem:[%s1854_s0 + $0xc0] sm:$0xff]   ;;  %v1360_v21 = vld [vmem:[%s1854_s0 + $0x48] sm:$0xff]  }
   0x8   :  { %v1361_v22 = vld [vmem:[%s1854_s0 + $0xc8] sm:$0xff]   ;;  %v1362_v23 = vld [vmem:[%s1854_s0 + $0x50] sm:$0xff]   ;;  %v1364_v25 = vld [vmem:[%s1854_s0 + $0x58] sm:$0xff]  }
   0x9   :  { %v1363_v24 = vld [vmem:[%s1854_s0 + $0xd0] sm:$0xff]   ;;  %v1365_v26 = vld [vmem:[%s1854_s0 + $0xd8] sm:$0xff]   ;;  %v1366_v27 = vld [vmem:[%s1854_s0 + $0x60] sm:$0xff]  }
   0xa   :  { %1271 = vmatmul.mubr.msk.bf16.vlgmr.msra.gmra.mxu0 %vm258_vm1, %v1344_v5  ;;  %1303 = vmatmul.mubr.msk.bf16.vlgmr.msra.gmra.mxu1 %vm258_vm1, %v1345_v6  ;;  %v1367_v28 = vld [vmem:[%s1854_s0 + $0xe0] sm:$0xff]   ;;  %v1368_v29 = vld [vmem:[%s1854_s0 + $0x68] sm:$0xff]   ;;  %v1370_v31 = vld [vmem:[%s1854_s0 + $0x70] sm:$0xff]  }
   0xb   :  { %1274 = vmatprep.mubr.msk.bf16.mxu0 %vm258_vm1, %v1346_v7  ;;  %1306 = vmatprep.mubr.msk.bf16.mxu1 %vm258_vm1, %v1347_v8  ;;  %v1369_v30 = vld [vmem:[%s1854_s0 + $0xe8] sm:$0xff]   ;;  %v1371_v32 = vld [vmem:[%s1854_s0 + $0xf0] sm:$0xff]   ;;  %v1372_v33 = vld [vmem:[%s1854_s0 + $0x78] sm:$0xff]  }
   0xc   :  { %v1373_v34 = vld [vmem:[%s1854_s0 + $0xf8] sm:$0xff]   ;;  %v1531_v35 = vld [vmem:[%s1855_s2] ss:$0 sm:$0xff] }
  0x12   :  { %1275 = vmatmul.mubr.msk.bf16.gmra.mxu0 %vm258_vm1, %v1348_v9  ;;  %1307 = vmatmul.mubr.msk.bf16.gmra.mxu1 %vm258_vm1, %v1349_v10 }
  0x13   :  { %1278 = vmatprep.mubr.msk.bf16.mxu0 %vm258_vm1, %v1350_v11  ;;  %1310 = vmatprep.mubr.msk.bf16.mxu1 %vm258_vm1, %v1351_v12 }
  0x1a   :  { %1279 = vmatmul.mubr.msk.bf16.gmra.mxu0 %vm258_vm1, %v1352_v13  ;;  %1311 = vmatmul.mubr.msk.bf16.gmra.mxu1 %vm258_vm1, %v1353_v14 }
  0x1b   :  { %1282 = vmatprep.mubr.msk.bf16.mxu0 %vm258_vm1, %v1354_v15  ;;  %1314 = vmatprep.mubr.msk.bf16.mxu1 %vm258_vm1, %v1355_v16 }
  0x22   :  { %1283 = vmatmul.mubr.msk.bf16.gmra.mxu0 %vm258_vm1, %v1356_v17  ;;  %1315 = vmatmul.mubr.msk.bf16.gmra.mxu1 %vm258_vm1, %v1357_v18 }
  0x23   :  { %1286 = vmatprep.mubr.msk.bf16.mxu0 %vm258_vm1, %v1358_v19  ;;  %1318 = vmatprep.mubr.msk.bf16.mxu1 %vm258_vm1, %v1359_v20 }
  0x2a   :  { %1287 = vmatmul.mubr.msk.bf16.gmra.mxu0 %vm258_vm1, %v1360_v21  ;;  %1319 = vmatmul.mubr.msk.bf16.gmra.mxu1 %vm258_vm1, %v1361_v22 }
  0x2b   :  { %1290 = vmatprep.mubr.msk.bf16.mxu0 %vm258_vm1, %v1362_v23  ;;  %1322 = vmatprep.mubr.msk.bf16.mxu1 %vm258_vm1, %v1363_v24 }
  0x32   :  { %1291 = vmatmul.mubr.msk.bf16.gmra.mxu0 %vm258_vm1, %v1364_v25  ;;  %1323 = vmatmul.mubr.msk.bf16.gmra.mxu1 %vm258_vm1, %v1365_v26 }
  0x33   :  { %1294 = vmatprep.mubr.msk.bf16.mxu0 %vm258_vm1, %v1366_v27  ;;  %1326 = vmatprep.mubr.msk.bf16.mxu1 %vm258_vm1, %v1367_v28 }
  0x3a   :  { %1295 = vmatmul.mubr.msk.bf16.gmra.mxu0 %vm258_vm1, %v1368_v29  ;;  %1327 = vmatmul.mubr.msk.bf16.gmra.mxu1 %vm258_vm1, %v1369_v30 }
  0x3b   :  { %1298 = vmatprep.mubr.msk.bf16.mxu0 %vm258_vm1, %v1370_v31  ;;  %1330 = vmatprep.mubr.msk.bf16.mxu1 %vm258_vm1, %v1371_v32 }
  0x42   :  { %1299 = vmatmul.mubr.msk.bf16.gmra.mxu0 %vm258_vm1, %v1372_v33  ;;  %1331 = vmatmul.mubr.msk.bf16.gmra.mxu1 %vm258_vm1, %v1373_v34 }
  0xca   :  { %v1272_v36 = vpop.f32.mrf.mxu0  ;;  %v1304_v37 = vpop.f32.mrf.mxu1 }
  0xcb   :  { %v402_v38 = vadd.f32 %v1272_v36, %v1531_v35  ;;  %v530_v39 = vadd.f32 %v1304_v37, %v1531_v35 }
  0xcc   :  { %v393_v40 = vpop.f32.mrf.mxu0  ;;  %v521_v41 = vpop.f32.mrf.mxu1 }
  0xcd   :  { %v650_v42 = vmax.f32 %v402_v38, 0.0  ;;  %v682_v43 = vmax.f32 %v530_v39, 0.0  ;;  %v394_v44 = vadd.f32 %v1531_v35, %v393_v40  ;;  %v522_v45 = vadd.f32 %v1531_v35, %v521_v41 }
  0xce   :  { %v1273_v46 = vpop.f32.mrf.mxu0  ;;  %v1305_v47 = vpop.f32.mrf.mxu1 }
  0xcf   :  { %v1170_v48 = vpack.c.bf16 %v650_v42, %v650_v42  ;;  %v1202_v49 = vpack.c.bf16 %v682_v43, %v682_v43  ;;  %v648_v50 = vmax.f32 %v394_v44, 0.0  ;;  %v680_v51 = vmax.f32 %v522_v45, 0.0 }
  0xd0   :  { %v405_v52 = vadd.f32 %v1273_v46, %v1531_v35  ;;  %v533_v53 = vadd.f32 %v1305_v47, %v1531_v35  ;;  %v396_v54 = vpop.f32.mrf.mxu0  ;;  %v524_v55 = vpop.f32.mrf.mxu1 }
  0xd1   :  { %971 = vst.msk [vmem:[%s1856_s3 + $0x8] sm:$0xf] %vm968_vm2, %v1170_v48  ;;  %1003 = vst.msk [vmem:[%s1856_s3 + $0x88] sm:$0xf] %vm968_vm2, %v1202_v49  ;;  %v1168_v56 = vpack.c.bf16 %v648_v50, %v648_v50  ;;  %v1200_v57 = vpack.c.bf16 %v680_v51, %v680_v51  ;;  %v397_v58 = vadd.f32 %v1531_v35, %v396_v54 }
  0xd2   :  { %v525_v59 = vadd.f32 %v1531_v35, %v524_v55  ;;  %v651_v60 = vmax.f32 %v405_v52, 0.0  ;;  %v683_v61 = vmax.f32 %v533_v53, 0.0  ;;  %v1276_v62 = vpop.f32.mrf.mxu0  ;;  %v1308_v63 = vpop.f32.mrf.mxu1 }
  0xd3   :  { %969 = vst.msk [vmem:[%s1856_s3] sm:$0xf] %vm968_vm2, %v1168_v56  ;;  %1001 = vst.msk [vmem:[%s1856_s3 + $0x80] sm:$0xf] %vm968_vm2, %v1200_v57  ;;  %v649_v0 = vmax.f32 %v397_v58, 0.0  ;;  %v418_v2 = vadd.f32 %v1276_v62, %v1531_v35  ;;  %v546_v3 = vadd.f32 %v1308_v63, %v1531_v35 }
  0xd4   :  { %v681_v1 = vmax.f32 %v525_v59, 0.0  ;;  %v1171_v4 = vpack.c.bf16 %v651_v60, %v651_v60  ;;  %v1203_v5 = vpack.c.bf16 %v683_v61, %v683_v61  ;;  %v409_v6 = vpop.f32.mrf.mxu0  ;;  %v537_v7 = vpop.f32.mrf.mxu1 }
  0xd5   :  { %v1169_v8 = vpack.c.bf16 %v649_v0, %v649_v0  ;;  %v654_v10 = vmax.f32 %v418_v2, 0.0  ;;  %v686_v11 = vmax.f32 %v546_v3, 0.0  ;;  %v410_v12 = vadd.f32 %v1531_v35, %v409_v6 }
  0xd6   :  { %v1201_v9 = vpack.c.bf16 %v681_v1, %v681_v1  ;;  %972 = vst.msk [vmem:[%s1856_s3 + $0xc] sm:$0xf] %vm968_vm2, %v1171_v4  ;;  %1004 = vst.msk [vmem:[%s1856_s3 + $0x8c] sm:$0xf] %vm968_vm2, %v1203_v5  ;;  %v538_v13 = vadd.f32 %v1531_v35, %v537_v7  ;;  %v1277_v14 = vpop.f32.mrf.mxu0  ;;  %v1309_v15 = vpop.f32.mrf.mxu1 }
  0xd7   :  { %970 = vst.msk [vmem:[%s1856_s3 + $0x4] sm:$0xf] %vm968_vm2, %v1169_v8  ;;  %v1174_v16 = vpack.c.bf16 %v654_v10, %v654_v10  ;;  %v1206_v17 = vpack.c.bf16 %v686_v11, %v686_v11  ;;  %v421_v18 = vadd.f32 %v1277_v14, %v1531_v35  ;;  %v549_v19 = vadd.f32 %v1309_v15, %v1531_v35 }
  0xd8   :  { %1002 = vst.msk [vmem:[%s1856_s3 + $0x84] sm:$0xf] %vm968_vm2, %v1201_v9  ;;  %v652_v20 = vmax.f32 %v410_v12, 0.0  ;;  %v684_v21 = vmax.f32 %v538_v13, 0.0  ;;  %v412_v22 = vpop.f32.mrf.mxu0  ;;  %v540_v23 = vpop.f32.mrf.mxu1 }
  0xd9   :  { %975 = vst.msk [vmem:[%s1856_s3 + $0x18] sm:$0xf] %vm968_vm2, %v1174_v16  ;;  %1007 = vst.msk [vmem:[%s1856_s3 + $0x98] sm:$0xf] %vm968_vm2, %v1206_v17  ;;  %v655_v24 = vmax.f32 %v421_v18, 0.0  ;;  %v687_v25 = vmax.f32 %v549_v19, 0.0  ;;  %v413_v26 = vadd.f32 %v1531_v35, %v412_v22  ;;  %v541_v27 = vadd.f32 %v1531_v35, %v540_v23 }
  0xda   :  { %v1172_v28 = vpack.c.bf16 %v652_v20, %v652_v20  ;;  %v1204_v29 = vpack.c.bf16 %v684_v21, %v684_v21  ;;  %v1280_v30 = vpop.f32.mrf.mxu0  ;;  %v1312_v31 = vpop.f32.mrf.mxu1 }
  0xdb   :  { %v1175_v32 = vpack.c.bf16 %v655_v24, %v655_v24  ;;  %v1207_v33 = vpack.c.bf16 %v687_v25, %v687_v25  ;;  %v653_v34 = vmax.f32 %v413_v26, 0.0  ;;  %v685_v36 = vmax.f32 %v541_v27, 0.0 }
  0xdc   :  { %973 = vst.msk [vmem:[%s1856_s3 + $0x10] sm:$0xf] %vm968_vm2, %v1172_v28  ;;  %1005 = vst.msk [vmem:[%s1856_s3 + $0x90] sm:$0xf] %vm968_vm2, %v1204_v29  ;;  %v434_v37 = vadd.f32 %v1280_v30, %v1531_v35  ;;  %v562_v38 = vadd.f32 %v1312_v31, %v1531_v35  ;;  %v425_v39 = vpop.f32.mrf.mxu0  ;;  %v553_v40 = vpop.f32.mrf.mxu1 }
  0xdd   :  { %976 = vst.msk [vmem:[%s1856_s3 + $0x1c] sm:$0xf] %vm968_vm2, %v1175_v32  ;;  %1008 = vst.msk [vmem:[%s1856_s3 + $0x9c] sm:$0xf] %vm968_vm2, %v1207_v33  ;;  %v1173_v41 = vpack.c.bf16 %v653_v34, %v653_v34  ;;  %v1205_v42 = vpack.c.bf16 %v685_v36, %v685_v36  ;;  %v426_v43 = vadd.f32 %v1531_v35, %v425_v39 }
  0xde   :  { %v554_v44 = vadd.f32 %v1531_v35, %v553_v40  ;;  %v658_v45 = vmax.f32 %v434_v37, 0.0  ;;  %v690_v46 = vmax.f32 %v562_v38, 0.0  ;;  %v1281_v47 = vpop.f32.mrf.mxu0  ;;  %v1313_v48 = vpop.f32.mrf.mxu1 }
  0xdf   :  { %974 = vst.msk [vmem:[%s1856_s3 + $0x14] sm:$0xf] %vm968_vm2, %v1173_v41  ;;  %1006 = vst.msk [vmem:[%s1856_s3 + $0x94] sm:$0xf] %vm968_vm2, %v1205_v42  ;;  %v656_v49 = vmax.f32 %v426_v43, 0.0  ;;  %v437_v51 = vadd.f32 %v1281_v47, %v1531_v35  ;;  %v565_v52 = vadd.f32 %v1313_v48, %v1531_v35 }
  0xe0   :  { %v688_v50 = vmax.f32 %v554_v44, 0.0  ;;  %v1178_v53 = vpack.c.bf16 %v658_v45, %v658_v45  ;;  %v1210_v54 = vpack.c.bf16 %v690_v46, %v690_v46  ;;  %v428_v55 = vpop.f32.mrf.mxu0  ;;  %v556_v56 = vpop.f32.mrf.mxu1 }
  0xe1   :  { %v1176_v57 = vpack.c.bf16 %v656_v49, %v656_v49  ;;  %v659_v59 = vmax.f32 %v437_v51, 0.0  ;;  %v691_v60 = vmax.f32 %v565_v52, 0.0  ;;  %v429_v61 = vadd.f32 %v1531_v35, %v428_v55 }
  0xe2   :  { %v1208_v58 = vpack.c.bf16 %v688_v50, %v688_v50  ;;  %979 = vst.msk [vmem:[%s1856_s3 + $0x28] sm:$0xf] %vm968_vm2, %v1178_v53  ;;  %1011 = vst.msk [vmem:[%s1856_s3 + $0xa8] sm:$0xf] %vm968_vm2, %v1210_v54  ;;  %v557_v62 = vadd.f32 %v1531_v35, %v556_v56  ;;  %v1284_v63 = vpop.f32.mrf.mxu0  ;;  %v1316_v0 = vpop.f32.mrf.mxu1 }
  0xe3   :  { %977 = vst.msk [vmem:[%s1856_s3 + $0x20] sm:$0xf] %vm968_vm2, %v1176_v57  ;;  %v1179_v1 = vpack.c.bf16 %v659_v59, %v659_v59  ;;  %v1211_v2 = vpack.c.bf16 %v691_v60, %v691_v60  ;;  %v450_v3 = vadd.f32 %v1284_v63, %v1531_v35  ;;  %v578_v4 = vadd.f32 %v1316_v0, %v1531_v35 }
  0xe4   :  { %1009 = vst.msk [vmem:[%s1856_s3 + $0xa0] sm:$0xf] %vm968_vm2, %v1208_v58  ;;  %v657_v5 = vmax.f32 %v429_v61, 0.0  ;;  %v689_v6 = vmax.f32 %v557_v62, 0.0  ;;  %v441_v7 = vpop.f32.mrf.mxu0  ;;  %v569_v8 = vpop.f32.mrf.mxu1 }
  0xe5   :  { %980 = vst.msk [vmem:[%s1856_s3 + $0x2c] sm:$0xf] %vm968_vm2, %v1179_v1  ;;  %1012 = vst.msk [vmem:[%s1856_s3 + $0xac] sm:$0xf] %vm968_vm2, %v1211_v2  ;;  %v662_v9 = vmax.f32 %v450_v3, 0.0  ;;  %v694_v10 = vmax.f32 %v578_v4, 0.0  ;;  %v442_v11 = vadd.f32 %v1531_v35, %v441_v7  ;;  %v570_v12 = vadd.f32 %v1531_v35, %v569_v8 }
  0xe6   :  { %v1177_v13 = vpack.c.bf16 %v657_v5, %v657_v5  ;;  %v1209_v14 = vpack.c.bf16 %v689_v6, %v689_v6  ;;  %v1285_v15 = vpop.f32.mrf.mxu0  ;;  %v1317_v16 = vpop.f32.mrf.mxu1 }
  0xe7   :  { %v1182_v17 = vpack.c.bf16 %v662_v9, %v662_v9  ;;  %v1214_v18 = vpack.c.bf16 %v694_v10, %v694_v10  ;;  %v660_v19 = vmax.f32 %v442_v11, 0.0  ;;  %v692_v20 = vmax.f32 %v570_v12, 0.0 }
  0xe8   :  { %978 = vst.msk [vmem:[%s1856_s3 + $0x24] sm:$0xf] %vm968_vm2, %v1177_v13  ;;  %1010 = vst.msk [vmem:[%s1856_s3 + $0xa4] sm:$0xf] %vm968_vm2, %v1209_v14  ;;  %v453_v21 = vadd.f32 %v1285_v15, %v1531_v35  ;;  %v581_v22 = vadd.f32 %v1317_v16, %v1531_v35  ;;  %v444_v23 = vpop.f32.mrf.mxu0  ;;  %v572_v24 = vpop.f32.mrf.mxu1 }
  0xe9   :  { %983 = vst.msk [vmem:[%s1856_s3 + $0x38] sm:$0xf] %vm968_vm2, %v1182_v17  ;;  %1015 = vst.msk [vmem:[%s1856_s3 + $0xb8] sm:$0xf] %vm968_vm2, %v1214_v18  ;;  %v1180_v25 = vpack.c.bf16 %v660_v19, %v660_v19  ;;  %v1212_v26 = vpack.c.bf16 %v692_v20, %v692_v20  ;;  %v445_v27 = vadd.f32 %v1531_v35, %v444_v23 }
  0xea   :  { %v573_v28 = vadd.f32 %v1531_v35, %v572_v24  ;;  %v663_v29 = vmax.f32 %v453_v21, 0.0  ;;  %v695_v30 = vmax.f32 %v581_v22, 0.0  ;;  %v1288_v31 = vpop.f32.mrf.mxu0  ;;  %v1320_v32 = vpop.f32.mrf.mxu1 }
  0xeb   :  { %981 = vst.msk [vmem:[%s1856_s3 + $0x30] sm:$0xf] %vm968_vm2, %v1180_v25  ;;  %1013 = vst.msk [vmem:[%s1856_s3 + $0xb0] sm:$0xf] %vm968_vm2, %v1212_v26  ;;  %v661_v33 = vmax.f32 %v445_v27, 0.0  ;;  %v466_v36 = vadd.f32 %v1288_v31, %v1531_v35  ;;  %v594_v37 = vadd.f32 %v1320_v32, %v1531_v35 }
  0xec   :  { %v693_v34 = vmax.f32 %v573_v28, 0.0  ;;  %v1183_v38 = vpack.c.bf16 %v663_v29, %v663_v29  ;;  %v1215_v39 = vpack.c.bf16 %v695_v30, %v695_v30  ;;  %v457_v40 = vpop.f32.mrf.mxu0  ;;  %v585_v41 = vpop.f32.mrf.mxu1 }
  0xed   :  { %v1181_v42 = vpack.c.bf16 %v661_v33, %v661_v33  ;;  %v666_v44 = vmax.f32 %v466_v36, 0.0  ;;  %v698_v45 = vmax.f32 %v594_v37, 0.0  ;;  %v458_v46 = vadd.f32 %v1531_v35, %v457_v40 }
  0xee   :  { %v1213_v43 = vpack.c.bf16 %v693_v34, %v693_v34  ;;  %984 = vst.msk [vmem:[%s1856_s3 + $0x3c] sm:$0xf] %vm968_vm2, %v1183_v38  ;;  %1016 = vst.msk [vmem:[%s1856_s3 + $0xbc] sm:$0xf] %vm968_vm2, %v1215_v39  ;;  %v586_v47 = vadd.f32 %v1531_v35, %v585_v41  ;;  %v1289_v48 = vpop.f32.mrf.mxu0  ;;  %v1321_v49 = vpop.f32.mrf.mxu1 }
  0xef   :  { %982 = vst.msk [vmem:[%s1856_s3 + $0x34] sm:$0xf] %vm968_vm2, %v1181_v42  ;;  %v1186_v50 = vpack.c.bf16 %v666_v44, %v666_v44  ;;  %v1218_v51 = vpack.c.bf16 %v698_v45, %v698_v45  ;;  %v469_v52 = vadd.f32 %v1289_v48, %v1531_v35  ;;  %v597_v53 = vadd.f32 %v1321_v49, %v1531_v35 }
  0xf0   :  { %1014 = vst.msk [vmem:[%s1856_s3 + $0xb4] sm:$0xf] %vm968_vm2, %v1213_v43  ;;  %v664_v54 = vmax.f32 %v458_v46, 0.0  ;;  %v696_v55 = vmax.f32 %v586_v47, 0.0  ;;  %v460_v56 = vpop.f32.mrf.mxu0  ;;  %v588_v57 = vpop.f32.mrf.mxu1 }
  0xf1   :  { %987 = vst.msk [vmem:[%s1856_s3 + $0x48] sm:$0xf] %vm968_vm2, %v1186_v50  ;;  %1019 = vst.msk [vmem:[%s1856_s3 + $0xc8] sm:$0xf] %vm968_vm2, %v1218_v51  ;;  %v667_v58 = vmax.f32 %v469_v52, 0.0  ;;  %v699_v59 = vmax.f32 %v597_v53, 0.0  ;;  %v461_v60 = vadd.f32 %v1531_v35, %v460_v56  ;;  %v589_v61 = vadd.f32 %v1531_v35, %v588_v57 }
  0xf2   :  { %v1184_v62 = vpack.c.bf16 %v664_v54, %v664_v54  ;;  %v1216_v63 = vpack.c.bf16 %v696_v55, %v696_v55  ;;  %v1292_v0 = vpop.f32.mrf.mxu0  ;;  %v1324_v1 = vpop.f32.mrf.mxu1 }
  0xf3   :  { %v1187_v2 = vpack.c.bf16 %v667_v58, %v667_v58  ;;  %v1219_v3 = vpack.c.bf16 %v699_v59, %v699_v59  ;;  %v665_v4 = vmax.f32 %v461_v60, 0.0  ;;  %v697_v5 = vmax.f32 %v589_v61, 0.0 }
  0xf4   :  { %985 = vst.msk [vmem:[%s1856_s3 + $0x40] sm:$0xf] %vm968_vm2, %v1184_v62  ;;  %1017 = vst.msk [vmem:[%s1856_s3 + $0xc0] sm:$0xf] %vm968_vm2, %v1216_v63  ;;  %v482_v6 = vadd.f32 %v1292_v0, %v1531_v35  ;;  %v610_v7 = vadd.f32 %v1324_v1, %v1531_v35  ;;  %v473_v8 = vpop.f32.mrf.mxu0  ;;  %v601_v9 = vpop.f32.mrf.mxu1 }
  0xf5   :  { %988 = vst.msk [vmem:[%s1856_s3 + $0x4c] sm:$0xf] %vm968_vm2, %v1187_v2  ;;  %1020 = vst.msk [vmem:[%s1856_s3 + $0xcc] sm:$0xf] %vm968_vm2, %v1219_v3  ;;  %v1185_v10 = vpack.c.bf16 %v665_v4, %v665_v4  ;;  %v1217_v11 = vpack.c.bf16 %v697_v5, %v697_v5  ;;  %v474_v12 = vadd.f32 %v1531_v35, %v473_v8 }
  0xf6   :  { %v602_v13 = vadd.f32 %v1531_v35, %v601_v9  ;;  %v670_v14 = vmax.f32 %v482_v6, 0.0  ;;  %v702_v15 = vmax.f32 %v610_v7, 0.0  ;;  %v1293_v16 = vpop.f32.mrf.mxu0  ;;  %v1325_v17 = vpop.f32.mrf.mxu1 }
  0xf7   :  { %986 = vst.msk [vmem:[%s1856_s3 + $0x44] sm:$0xf] %vm968_vm2, %v1185_v10  ;;  %1018 = vst.msk [vmem:[%s1856_s3 + $0xc4] sm:$0xf] %vm968_vm2, %v1217_v11  ;;  %v668_v18 = vmax.f32 %v474_v12, 0.0  ;;  %v485_v20 = vadd.f32 %v1293_v16, %v1531_v35  ;;  %v613_v21 = vadd.f32 %v1325_v17, %v1531_v35 }
  0xf8   :  { %v700_v19 = vmax.f32 %v602_v13, 0.0  ;;  %v1190_v22 = vpack.c.bf16 %v670_v14, %v670_v14  ;;  %v1222_v23 = vpack.c.bf16 %v702_v15, %v702_v15  ;;  %v476_v24 = vpop.f32.mrf.mxu0  ;;  %v604_v25 = vpop.f32.mrf.mxu1 }
  0xf9   :  { %v1188_v26 = vpack.c.bf16 %v668_v18, %v668_v18  ;;  %v671_v28 = vmax.f32 %v485_v20, 0.0  ;;  %v703_v29 = vmax.f32 %v613_v21, 0.0  ;;  %v477_v30 = vadd.f32 %v1531_v35, %v476_v24 }
  0xfa   :  { %v1220_v27 = vpack.c.bf16 %v700_v19, %v700_v19  ;;  %991 = vst.msk [vmem:[%s1856_s3 + $0x58] sm:$0xf] %vm968_vm2, %v1190_v22  ;;  %1023 = vst.msk [vmem:[%s1856_s3 + $0xd8] sm:$0xf] %vm968_vm2, %v1222_v23  ;;  %v605_v31 = vadd.f32 %v1531_v35, %v604_v25  ;;  %v1296_v32 = vpop.f32.mrf.mxu0  ;;  %v1328_v33 = vpop.f32.mrf.mxu1 }
  0xfb   :  { %989 = vst.msk [vmem:[%s1856_s3 + $0x50] sm:$0xf] %vm968_vm2, %v1188_v26  ;;  %v1191_v34 = vpack.c.bf16 %v671_v28, %v671_v28  ;;  %v1223_v36 = vpack.c.bf16 %v703_v29, %v703_v29  ;;  %v498_v37 = vadd.f32 %v1296_v32, %v1531_v35  ;;  %v626_v38 = vadd.f32 %v1328_v33, %v1531_v35 }
  0xfc   :  { %1021 = vst.msk [vmem:[%s1856_s3 + $0xd0] sm:$0xf] %vm968_vm2, %v1220_v27  ;;  %v669_v39 = vmax.f32 %v477_v30, 0.0  ;;  %v701_v40 = vmax.f32 %v605_v31, 0.0  ;;  %v489_v41 = vpop.f32.mrf.mxu0  ;;  %v617_v42 = vpop.f32.mrf.mxu1 }
  0xfd   :  { %992 = vst.msk [vmem:[%s1856_s3 + $0x5c] sm:$0xf] %vm968_vm2, %v1191_v34  ;;  %1024 = vst.msk [vmem:[%s1856_s3 + $0xdc] sm:$0xf] %vm968_vm2, %v1223_v36  ;;  %v674_v43 = vmax.f32 %v498_v37, 0.0  ;;  %v706_v44 = vmax.f32 %v626_v38, 0.0  ;;  %v490_v45 = vadd.f32 %v1531_v35, %v489_v41  ;;  %v618_v46 = vadd.f32 %v1531_v35, %v617_v42 }
  0xfe   :  { %v1189_v47 = vpack.c.bf16 %v669_v39, %v669_v39  ;;  %v1221_v48 = vpack.c.bf16 %v701_v40, %v701_v40  ;;  %v1297_v49 = vpop.f32.mrf.mxu0  ;;  %v1329_v50 = vpop.f32.mrf.mxu1 }
  0xff   :  { %v1194_v51 = vpack.c.bf16 %v674_v43, %v674_v43  ;;  %v1226_v52 = vpack.c.bf16 %v706_v44, %v706_v44  ;;  %v672_v53 = vmax.f32 %v490_v45, 0.0  ;;  %v704_v54 = vmax.f32 %v618_v46, 0.0 }
 0x100   :  { %990 = vst.msk [vmem:[%s1856_s3 + $0x54] sm:$0xf] %vm968_vm2, %v1189_v47  ;;  %1022 = vst.msk [vmem:[%s1856_s3 + $0xd4] sm:$0xf] %vm968_vm2, %v1221_v48  ;;  %v501_v55 = vadd.f32 %v1297_v49, %v1531_v35  ;;  %v629_v56 = vadd.f32 %v1329_v50, %v1531_v35  ;;  %v492_v57 = vpop.f32.mrf.mxu0  ;;  %v620_v58 = vpop.f32.mrf.mxu1 }
 0x101   :  { %995 = vst.msk [vmem:[%s1856_s3 + $0x68] sm:$0xf] %vm968_vm2, %v1194_v51  ;;  %1027 = vst.msk [vmem:[%s1856_s3 + $0xe8] sm:$0xf] %vm968_vm2, %v1226_v52  ;;  %v1192_v59 = vpack.c.bf16 %v672_v53, %v672_v53  ;;  %v1224_v60 = vpack.c.bf16 %v704_v54, %v704_v54  ;;  %v493_v61 = vadd.f32 %v1531_v35, %v492_v57 }
 0x102   :  { %v621_v62 = vadd.f32 %v1531_v35, %v620_v58  ;;  %v675_v63 = vmax.f32 %v501_v55, 0.0  ;;  %v707_v0 = vmax.f32 %v629_v56, 0.0  ;;  %v1300_v1 = vpop.f32.mrf.mxu0  ;;  %v1332_v2 = vpop.f32.mrf.mxu1 }
 0x103   :  { %993 = vst.msk [vmem:[%s1856_s3 + $0x60] sm:$0xf] %vm968_vm2, %v1192_v59  ;;  %1025 = vst.msk [vmem:[%s1856_s3 + $0xe0] sm:$0xf] %vm968_vm2, %v1224_v60  ;;  %v673_v3 = vmax.f32 %v493_v61, 0.0  ;;  %v514_v5 = vadd.f32 %v1300_v1, %v1531_v35  ;;  %v642_v6 = vadd.f32 %v1332_v2, %v1531_v35 }
 0x104   :  { %v705_v4 = vmax.f32 %v621_v62, 0.0  ;;  %v1195_v7 = vpack.c.bf16 %v675_v63, %v675_v63  ;;  %v1227_v8 = vpack.c.bf16 %v707_v0, %v707_v0  ;;  %v505_v9 = vpop.f32.mrf.mxu0  ;;  %v633_v10 = vpop.f32.mrf.mxu1 }
 0x105   :  { %v1193_v11 = vpack.c.bf16 %v673_v3, %v673_v3  ;;  %v678_v13 = vmax.f32 %v514_v5, 0.0  ;;  %v710_v14 = vmax.f32 %v642_v6, 0.0  ;;  %v506_v15 = vadd.f32 %v1531_v35, %v505_v9 }
 0x106   :  { %v1225_v12 = vpack.c.bf16 %v705_v4, %v705_v4  ;;  %996 = vst.msk [vmem:[%s1856_s3 + $0x6c] sm:$0xf] %vm968_vm2, %v1195_v7  ;;  %1028 = vst.msk [vmem:[%s1856_s3 + $0xec] sm:$0xf] %vm968_vm2, %v1227_v8  ;;  %v634_v16 = vadd.f32 %v1531_v35, %v633_v10  ;;  %v1301_v17 = vpop.f32.mrf.mxu0  ;;  %v1333_v18 = vpop.f32.mrf.mxu1 }
 0x107   :  { %994 = vst.msk [vmem:[%s1856_s3 + $0x64] sm:$0xf] %vm968_vm2, %v1193_v11  ;;  %v1198_v19 = vpack.c.bf16 %v678_v13, %v678_v13  ;;  %v1230_v20 = vpack.c.bf16 %v710_v14, %v710_v14  ;;  %v517_v21 = vadd.f32 %v1301_v17, %v1531_v35  ;;  %v645_v22 = vadd.f32 %v1333_v18, %v1531_v35 }
 0x108   :  { %1026 = vst.msk [vmem:[%s1856_s3 + $0xe4] sm:$0xf] %vm968_vm2, %v1225_v12  ;;  %v676_v23 = vmax.f32 %v506_v15, 0.0  ;;  %v708_v24 = vmax.f32 %v634_v16, 0.0  ;;  %v508_v25 = vpop.f32.mrf.mxu0  ;;  %v636_v26 = vpop.f32.mrf.mxu1 }
 0x109   :  { %999 = vst.msk [vmem:[%s1856_s3 + $0x78] sm:$0xf] %vm968_vm2, %v1198_v19  ;;  %1031 = vst.msk [vmem:[%s1856_s3 + $0xf8] sm:$0xf] %vm968_vm2, %v1230_v20  ;;  %v679_v27 = vmax.f32 %v517_v21, 0.0  ;;  %v711_v28 = vmax.f32 %v645_v22, 0.0  ;;  %v509_v29 = vadd.f32 %v1531_v35, %v508_v25  ;;  %v637_v30 = vadd.f32 %v1531_v35, %v636_v26 }
 0x10a   :  { %v1196_v31 = vpack.c.bf16 %v676_v23, %v676_v23  ;;  %v1228_v32 = vpack.c.bf16 %v708_v24, %v708_v24 }
 0x10b   :  { %v1199_v33 = vpack.c.bf16 %v679_v27, %v679_v27  ;;  %v1231_v34 = vpack.c.bf16 %v711_v28, %v711_v28  ;;  %v677_v36 = vmax.f32 %v509_v29, 0.0  ;;  %v709_v37 = vmax.f32 %v637_v30, 0.0 }
 0x10c   :  { %997 = vst.msk [vmem:[%s1856_s3 + $0x70] sm:$0xf] %vm968_vm2, %v1196_v31  ;;  %1029 = vst.msk [vmem:[%s1856_s3 + $0xf0] sm:$0xf] %vm968_vm2, %v1228_v32 }
 0x10d   :  { %1000 = vst.msk [vmem:[%s1856_s3 + $0x7c] sm:$0xf] %vm968_vm2, %v1199_v33  ;;  %1032 = vst.msk [vmem:[%s1856_s3 + $0xfc] sm:$0xf] %vm968_vm2, %v1231_v34  ;;  %v1197_v35 = vpack.c.bf16 %v677_v36, %v677_v36  ;;  %v1229_v38 = vpack.c.bf16 %v709_v37, %v709_v37 }
 0x10f   :  { %998 = vst.msk [vmem:[%s1856_s3 + $0x74] sm:$0xf] %vm968_vm2, %v1197_v35  ;;  %1030 = vst.msk [vmem:[%s1856_s3 + $0xf4] sm:$0xf] %vm968_vm2, %v1229_v38 }

// kernel: spectrogram_model_forward.3
= control target key start
LH: loop header
LB: loop body
LE: loop exit
PB: predicated region body
PF: predicated region fallthrough
CT: control target
= control target key end

     0   :  { %s2195_s20 = smov 0   ;;  %s2608_s0 = inlined_call_operand.vmem [shape: bf16[8,9,9,32], index: 0, kind: input, shape index: {}]   ;;  %s2609_s1 = inlined_call_operand.vmem [shape: bf16[9,32,128], index: 1, kind: input, shape index: {}]   ;;  %s2610_s2 = inlined_call_operand.vmem [shape: f32[1,128], index: 2, kind: input, shape index: {}]   ;;  %s2611_s3 = inlined_call_operand.vmem [shape: f32[128,1], index: 3, kind: input, shape index: {}]   ;;  %s2612_s4 = inlined_call_operand.<no memory space> [shape: f32[1,1], index: 4, kind: input, shape index: {}]   ;;  %s2613_s5 = inlined_call_operand.vmem [shape: f32[2,1,1], index: 5, kind: output, shape index: {}]  }
   0x1   :  { %v10_v0 = vstv %s2612_s4 }
   0x2   :  { %11 = vst [vmem:[#allocation2] sm:$0x1] %v10_v0 }
   0x3 LB: > { %s2201_s21 = sadd.s32 4294967295, %s2158_s20   ;;  %p1724_p0 = scmp.ge.s32.totalorder %s2158_s20, 1  ;;  %s2158_s20 = sphi %s2195_s20, %s17_s20  }
   0x4   : > { %p191_p1 = scmp.lt.s32.totalorder %s2158_s20, 3 }
   0x6   : > { %p192_p2 = pnand %p1724_p0, %p191_p1 }
   0x8   : > { %195 = sbr.rel (%p192_p2) target bundleno = 522 (0x20a), region = 40 }
   0xd   : > { %v2110_v1 = vld [vmem:[%s2609_s1 + $0x18] sm:$0xff]   ;;  %s1725_s4 = sshll.u32 %s2201_s21, 2  ;;  %v2111_v2 = vld [vmem:[%s2609_s1 + $0x8] sm:$0xff]   ;;  %v2112_v3 = vld [vmem:[%s2609_s1 + $0x10] sm:$0xff]   ;;  %vm324_vm0 = vcmask 261120   ;;  %vm2161_vm4 = vmmov 0  }
   0xe   : > { %p219_p3 = scmp.lt.s32.totalorder %s1725_s4, 7  ;;  %1956 = vmatprep.subr.bf16.mxu0 %v2110_v1  ;;  %1968 = vmatprep.subr.bf16.mxu1 %v2111_v2  ;;  %v2113_v4 = vld [vmem:[%s2609_s1] sm:$0xff]   ;;  %v2119_v5 = vld [vmem:[%s2609_s1 + $0x28] sm:$0xff]   ;;  %v2127_v6 = vld [vmem:[%s2609_s1 + $0x38] sm:$0xff]   ;;  %vm511_vm1 = vsmask.f32 3328 }
   0xf   : > { %1957 = vmatpush3.bf16.msra.mxu0 %v2110_v1  ;;  %1969 = vmatpush3.bf16.msra.mxu1 %v2111_v2  ;;  %v2124_v10 = vld [vmem:[%s2609_s1 + $0x20] sm:$0xff]   ;;  %v2128_v25 = vld [vmem:[%s2609_s1 + $0x30] sm:$0xff]   ;;  %v2276_v31 = vld [vmem:[%s2609_s1 + $0x48] sm:$0xff]   ;;  %vm512_vm2 = vsmask.f32 7440  ;;  %p225_p4 = scmp.lt.s32.totalorder %s2201_s21, 1 }
  0x10   : > { %s2625_s4 = smov (!%p219_p3, %s1725_s4), 7  ;;  %1958 = vmatprep.subr.bf16.mxu0 %v2112_v3  ;;  %1970 = vmatprep.subr.bf16.mxu1 %v2113_v4  ;;  %v2309_v52 = vld [vmem:[%s2609_s1 + $0x58] sm:$0xff]   ;;  %vm2328_vm3 = vmor %vm511_vm1, %vm512_vm2  ;;  %vm1671_vm5 = vcmask 0  }
  0x11   : > { %s2099_s7 = smul.u32 72, %s2625_s4  ;;  %s2627_s21 = smov (!%p225_p4, %s2201_s21), 1 }
  0x12   : > { %s227_s26 = scalar_lea.vmem %s2613_s5, %s2627_s21 }
  0x13   : > { %1959 = vmatpush3.bf16.msra.mxu0 %v2112_v3  ;;  %s2227_s12 = scalar_lea.vmem %s2608_s0, %s2099_s7  ;;  %1971 = vmatpush3.bf16.msra.mxu1 %v2113_v4 }
  0x14   : > { %v1727_v7 = vld [vmem:[%s2227_s12 + $0x48] sm:$0xf]  ;;  %v2231_v8 = vld [vmem:[%s2227_s12 + $0x50] sm:$0xf]  ;;  %v2234_v9 = vld [vmem:[%s2227_s12 + $0x58] sm:$0xf]  ;;  %1980 = vmatprep.subr.bf16.mxu0 %v2119_v5  ;;  %1992 = vmatprep.subr.bf16.mxu1 %v2127_v6 }
  0x15   : > { %v2240_v11 = vld [vmem:[%s2227_s12 + $0x60] sm:$0xf]  ;;  %v2243_v12 = vld [vmem:[%s2227_s12 + $0x68] sm:$0xf]  ;;  %v1764_v13 = vcombine.low %v1727_v7, %v2231_v8  ;;  %v2253_v19 = vld [vmem:[%s2227_s12 + $0x10] sm:$0xf] }
  0x16   : > { %v229_v14 = vld [vmem:[%s2227_s12] sm:$0xf]  ;;  %v1765_v15 = vcombine.low %v2234_v9, %v2240_v11  ;;  %v2250_v16 = vld [vmem:[%s2227_s12 + $0x8] sm:$0xf]  ;;  %v2260_v23 = vld [vmem:[%s2227_s12 + $0x18] sm:$0xf] }
  0x17   : > { %v515_v17 = vshrl.u32 %v229_v14, 16  ;;  %v518_v18 = vshll.u32 %v229_v14, 16  ;;  %1960 = vmatprep.mubr.msk.bf16.mxu0 %vm324_vm0, %v1764_v13  ;;  %v1774_v20 = vcombine.low %v229_v14, %v2250_v16  ;;  %v529_v21 = vshrl.u32 %v2250_v16, 16  ;;  %v2271_v30 = vld [vmem:[%s2227_s12 + $0x70] sm:$0xf] }
  0x18   : > { %v532_v22 = vshll.u32 %v2250_v16, 16  ;;  %v543_v24 = vshrl.u32 %v2253_v19, 16  ;;  %1961 = vmatmul.mubr.msk.bf16.vlgmr.msra.gmra.mxu0 %vm324_vm0, %v1765_v15  ;;  %v1775_v28 = vcombine.low %v2253_v19, %v2260_v23  ;;  %v546_v29 = vshll.u32 %v2253_v19, 16  ;;  %v2281_v36 = vld [vmem:[%s2227_s12 + $0x20] sm:$0xf] }
  0x19   : > { %v517_v26 = vrot.slane %v515_v17, 4  ;;  %v520_v27 = vrot.slane %v518_v18, 5  ;;  %1972 = vmatprep.mubr.msk.bf16.mxu1 %vm324_vm0, %v1774_v20  ;;  %v531_v32 = vrot.slane %v529_v21, 4  ;;  %v557_v35 = vshrl.u32 %v2260_v23, 16  ;;  %1981 = vmatpush3.bf16.msra.mxu0 %v2119_v5  ;;  %v2288_v41 = vld [vmem:[%s2227_s12 + $0x28] sm:$0xf] }
  0x1a   : > { %v534_v33 = vrot.slane %v532_v22, 5  ;;  %v545_v34 = vrot.slane %v543_v24, 4  ;;  %1973 = vmatmul.mubr.msk.bf16.vlgmr.msra.gmra.mxu1 %vm324_vm0, %v1775_v28  ;;  %v548_v38 = vrot.slane %v546_v29, 5  ;;  %v560_v39 = vshll.u32 %v2260_v23, 16  ;;  %1982 = vmatprep.subr.bf16.mxu0 %v2124_v10  ;;  %v2291_v42 = vld [vmem:[%s2227_s12 + $0x78] sm:$0xf] }
  0x1b   : > { %v521_v37 = vor.u32 %v520_v27, %v517_v26  ;;  %v1766_v40 = vcombine.low %v2243_v12, %v2271_v30  ;;  %v559_v44 = vrot.slane %v557_v35, 4  ;;  %v1776_v45 = vcombine.low %v2281_v36, %v2288_v41  ;;  %v2296_v46 = vld [vmem:[%s2227_s12 + $0x80] sm:$0xf]  ;;  %v2299_v47 = vld [vmem:[%s2227_s12 + $0x30] sm:$0xf]  ;;  %1993 = vmatpush3.bf16.msra.mxu1 %v2127_v6  ;;  %v1597_v6 = vld [vmem:[%s2611_s3 + $0x68] sm:$0xff] }
  0x1c   : > { %v535_v43 = vor.u32 %v534_v33, %v531_v32  ;;  %v549_v48 = vor.u32 %v548_v38, %v545_v34  ;;  %v562_v49 = vrot.slane %v560_v39, 5  ;;  %v571_v50 = vshrl.u32 %v2281_v36, 16  ;;  %v2304_v51 = vld [vmem:[%s2227_s12 + $0x38] sm:$0xf]  ;;  %1994 = vmatprep.subr.bf16.mxu1 %v2128_v25  ;;  %v230_v57 = vld [vmem:[%s2227_s12 + $0x4] sm:$0x1] }
  0x1d   : > { %1964 = vmatprep.mubr.msk.bf16.mxu0 %vm324_vm0, %v1766_v40  ;;  %v522_v53 = vrot.slane %v521_v37, 4  ;;  %1976 = vmatprep.mubr.msk.bf16.mxu1 %vm324_vm0, %v1776_v45  ;;  %v574_v55 = vshll.u32 %v2281_v36, 16  ;;  %v585_v56 = vshrl.u32 %v2288_v41, 16  ;;  %v588_v59 = vshll.u32 %v2288_v41, 16  ;;  %v232_v62 = vld [vmem:[%s2227_s12 + $0xc] sm:$0x1] }
  0x1e   : > { %v536_v54 = vrot.slane %v535_v43, 4  ;;  %1983 = vmatpush3.bf16.msra.mxu0 %v2124_v10  ;;  %v563_v58 = vor.u32 %v562_v49, %v559_v44  ;;  %v1767_v60 = vcombine.low %v2291_v42, %v2296_v46  ;;  %v1777_v61 = vcombine.low %v2299_v47, %v2304_v51  ;;  %v234_v10 = vld [vmem:[%s2227_s12 + $0x14] sm:$0x1]  ;;  %v236_v13 = vld [vmem:[%s2227_s12 + $0x1c] sm:$0x1]  ;;  %v2132_v40 = vld [vmem:[%s2609_s1 + $0x40] sm:$0xff]  }
  0x1f   : > { %2004 = vmatprep.subr.bf16.mxu0 %v2276_v31  ;;  %v550_v63 = vrot.slane %v549_v48, 4  ;;  %v599_v0 = vshrl.u32 %v2299_v47, 16  ;;  %v602_v1 = vshll.u32 %v2299_v47, 16  ;;  %v613_v2 = vshrl.u32 %v2304_v51, 16  ;;  %1995 = vmatpush3.bf16.msra.mxu1 %v2128_v25  ;;  %v1736_v18 = vld [vmem:[%s2227_s12 + $0x90] sm:$0xf] }
  0x20   : > { %1965 = vmatmul.mubr.msk.bf16.gmra.mxu0 %vm324_vm0, %v1767_v60  ;;  %v616_v3 = vshll.u32 %v2304_v51, 16  ;;  %v524_v4 = vshll.u32 %v230_v57, 16  ;;  %2016 = vmatprep.subr.bf16.mxu1 %v2309_v52  ;;  %v564_v5 = vrot.slane %v563_v58, 4  ;;  %v538_v7 = vshll.u32 %v232_v62, 16  ;;  %v1738_v22 = vld [vmem:[%s2227_s12 + $0x98] sm:$0xf] }
  0x21   : > { %v552_v15 = vshll.u32 %v234_v10, 16  ;;  %v566_v17 = vshll.u32 %v236_v13, 16  ;;  %v573_v20 = vrot.slane %v571_v50, 4  ;;  %v985_v24 = vshrl.u32 %v1736_v18, 16  ;;  %v1740_v33 = vld [vmem:[%s2227_s12 + $0xa0] sm:$0xf] }
  0x22   : > { %1977 = vmatmul.mubr.msk.bf16.gmra.mxu1 %vm324_vm0, %v1777_v61  ;;  %v526_v14 = vrot.slane %v524_v4, 5  ;;  %v540_v21 = vrot.slane %v538_v7, 5  ;;  %v988_v25 = vshll.u32 %v1736_v18, 16  ;;  %v576_v26 = vrot.slane %v574_v55, 5  ;;  %v1742_v34 = vld [vmem:[%s2227_s12 + $0xa8] sm:$0xf] }
  0x23   : > { %v554_v28 = vrot.slane %v552_v15, 5  ;;  %v568_v29 = vrot.slane %v566_v17, 5  ;;  %v1802_v32 = vcombine.low %v1736_v18, %v1738_v22  ;;  %v2345_v37 = vrot.slane %v985_v24, 4  ;;  %v238_v49 = vld [vmem:[%s2227_s12 + $0x24] sm:$0x1]  ;;  %v2136_v50 = vld [vmem:[%s2609_s1 + $0x50] sm:$0xff]  }
  0x24   : > { %v527_v27 = vsel %vm2328_vm3, %v522_v53, %v526_v14  ;;  %v2343_v35 = vsel %vm2328_vm3, %v536_v54, %v540_v21  ;;  %v999_v38 = vshrl.u32 %v1738_v22, 16  ;;  %v587_v39 = vrot.slane %v585_v56, 4  ;;  %v240_v57 = vld [vmem:[%s2227_s12 + $0x2c] sm:$0x1]  ;;  %v244_v13 = vld [vmem:[%s2227_s12 + $0x3c] sm:$0x1] }
  0x25   : > { %v1788_v43 = vcombine.low %v527_v27, %v2343_v35  ;;  %v2353_v44 = vsel %vm2328_vm3, %v550_v63, %v554_v28  ;;  %v2357_v45 = vsel %vm2328_vm3, %v564_v5, %v568_v29  ;;  %1996 = vmatprep.mubr.msk.bf16.mxu1 %vm324_vm0, %v1802_v32  ;;  %v1002_v48 = vshll.u32 %v1738_v22, 16  ;;  %v242_v63 = vld [vmem:[%s2227_s12 + $0x34] sm:$0x1]  ;;  %v2382_v14 = vld [vmem:[%s2609_s1 + $0x68] sm:$0xff]  }
  0x26   : > { %v1789_v53 = vcombine.low %v2353_v44, %v2357_v45  ;;  %v2366_v54 = vrot.slane %v988_v25, 5  ;;  %v1803_v55 = vcombine.low %v1740_v33, %v1742_v34  ;;  %v1013_v56 = vshrl.u32 %v1740_v33, 16 }
  0x27   : > { %1984 = vmatprep.mubr.msk.bf16.mxu0 %vm324_vm0, %v1788_v43  ;;  %v2370_v58 = vrot.slane %v999_v38, 4  ;;  %v2372_v60 = vrot.slane %v1002_v48, 5  ;;  %v1016_v61 = vshll.u32 %v1740_v33, 16  ;;  %v1027_v62 = vshrl.u32 %v1742_v34, 16  ;;  %v1748_v33 = vld [vmem:[%s2227_s12 + $0xc0] sm:$0xf] }
  0x28   : > { %1985 = vmatmul.mubr.msk.bf16.vlgmr.msra.gmra.mxu0 %vm324_vm0, %v1789_v53  ;;  %v1030_v4 = vshll.u32 %v1742_v34, 16  ;;  %v577_v5 = vor.u32 %v576_v26, %v573_v20  ;;  %v580_v7 = vshll.u32 %v238_v49, 16  ;;  %v590_v10 = vrot.slane %v588_v59, 5  ;;  %v1744_v59 = vld [vmem:[%s2227_s12 + $0xb0] sm:$0xf]  ;;  %v2400_v26 = vld [vmem:[%s2609_s1 + $0x78] sm:$0xff]  }
  0x29   : > { %2005 = vmatpush3.bf16.msra.mxu0 %v2276_v31  ;;  %v2386_v15 = vrot.slane %v1013_v56, 4  ;;  %v2388_v17 = vrot.slane %v1016_v61, 5  ;;  %v2390_v18 = vrot.slane %v1027_v62, 4  ;;  %v594_v20 = vshll.u32 %v240_v57, 16  ;;  %v1746_v31 = vld [vmem:[%s2227_s12 + $0xb8] sm:$0xf] }
  0x2a   : > { %1997 = vmatmul.mubr.msk.bf16.vlgmr.msra.gmra.mxu1 %vm324_vm0, %v1803_v55  ;;  %v578_v21 = vrot.slane %v577_v5, 4  ;;  %v582_v22 = vrot.slane %v580_v7, 5  ;;  %v591_v24 = vor.u32 %v590_v10, %v587_v39  ;;  %2006 = vmatprep.subr.bf16.mxu0 %v2132_v40  ;;  %v601_v25 = vrot.slane %v599_v0, 4  ;;  %v1750_v34 = vld [vmem:[%s2227_s12 + $0xc8] sm:$0xf] }
  0x2b   : > { %2017 = vmatpush3.bf16.msra.mxu1 %v2309_v52  ;;  %v596_v27 = vrot.slane %v594_v20, 5  ;;  %v604_v28 = vrot.slane %v602_v1, 5  ;;  %v608_v29 = vshll.u32 %v242_v63, 16  ;;  %v615_v32 = vrot.slane %v613_v2, 4  ;;  %v2137_v7 = vld [vmem:[%s2227_s12 + $0xd8] ss:$8 sps:$4 sm:$0xff]  }
  0x2c   : > { %2018 = vmatprep.subr.bf16.mxu1 %v2136_v50  ;;  %v2410_v0 = vsel %vm2328_vm3, %v578_v21, %v582_v22  ;;  %v592_v52 = vrot.slane %v591_v24, 4  ;;  %v618_v38 = vrot.slane %v616_v3, 5  ;;  %v622_v39 = vshll.u32 %v244_v13, 16 }
  0x2d   : > { %v1032_v43 = vrot.slane %v1030_v4, 5  ;;  %v605_v48 = vor.u32 %v604_v28, %v601_v25  ;;  %v610_v49 = vrot.slane %v608_v29, 5  ;;  %2007 = vmatpush3.bf16.msra.mxu0 %v2132_v40  ;;  %v1804_v1 = vcombine.low %v1744_v59, %v1746_v31 }
  0x2e   : > { %v2416_v2 = vsel %vm2328_vm3, %v592_v52, %v596_v27  ;;  %v619_v53 = vor.u32 %v618_v38, %v615_v32  ;;  %v624_v55 = vrot.slane %v622_v39, 5  ;;  %v1041_v56 = vshrl.u32 %v1744_v59, 16  ;;  %2028 = vmatprep.subr.bf16.mxu0 %v2382_v14  ;;  %v1737_v52 = vld [vmem:[%s2227_s12 + $0x94] sm:$0x1] }
  0x2f   : > { %2019 = vmatpush3.bf16.msra.mxu1 %v2136_v50  ;;  %v1790_v3 = vcombine.low %v2410_v0, %v2416_v2  ;;  %v606_v57 = vrot.slane %v605_v48, 4  ;;  %2000 = vmatprep.mubr.msk.bf16.mxu1 %vm324_vm0, %v1804_v1  ;;  %v1044_v61 = vshll.u32 %v1744_v59, 16  ;;  %v1055_v40 = vshrl.u32 %v1746_v31, 16  ;;  %v1739_v48 = vld [vmem:[%s2227_s12 + $0x9c] sm:$0x1] }
  0x30   : > { %2040 = vmatprep.subr.bf16.mxu1 %v2400_v26  ;;  %v620_v62 = vrot.slane %v619_v53, 4  ;;  %v1043_v63 = vrot.slane %v1041_v56, 4  ;;  %v1058_v4 = vshll.u32 %v1746_v31, 16  ;;  %v1805_v5 = vcombine.low %v1748_v33, %v1750_v34  ;;  %v1741_v53 = vld [vmem:[%s2227_s12 + $0xa4] sm:$0x1] }
  0x31   : > { %1988 = vmatprep.mubr.msk.bf16.mxu0 %vm324_vm0, %v1790_v3  ;;  %v2427_v50 = vsel %vm2328_vm3, %v606_v57, %v610_v49  ;;  %v1046_v10 = vrot.slane %v1044_v61, 5  ;;  %v1057_v13 = vrot.slane %v1055_v40, 4  ;;  %v1069_v20 = vshrl.u32 %v1748_v33, 16 }
  0x32   : > { %v2431_v59 = vsel %vm2328_vm3, %v620_v62, %v624_v55  ;;  %v1060_v21 = vrot.slane %v1058_v4, 5  ;;  %2001 = vmatmul.mubr.msk.bf16.gmra.mxu1 %vm324_vm0, %v1805_v5  ;;  %v1072_v22 = vshll.u32 %v1748_v33, 16  ;;  %v1083_v24 = vshrl.u32 %v1750_v34, 16  ;;  %v1743_v55 = vld [vmem:[%s2227_s12 + $0xac] sm:$0x1] }
  0x33   : > { %v1791_v25 = vcombine.low %v2427_v50, %v2431_v59  ;;  %v1071_v31 = vrot.slane %v1069_v20, 4  ;;  %v1086_v27 = vshll.u32 %v1750_v34, 16  ;;  %v991_v28 = vor.u32 %v2366_v54, %v2345_v37  ;;  %v2140_v62 = vld [vmem:[%s2227_s12 + $0xf8] ss:$8 sps:$4 sm:$0xff]  }
  0x34   : > { %v1074_v29 = vrot.slane %v1072_v22, 5  ;;  %v1085_v32 = vrot.slane %v1083_v24, 4  ;;  %v1005_v38 = vor.u32 %v2372_v60, %v2370_v58  ;;  %v1019_v33 = vor.u32 %v2388_v17, %v2386_v15  ;;  %v2139_v60 = vld [vmem:[%s2227_s12 + $0xe8] ss:$8 sps:$4 sm:$0xff]   ;;  %v1747_v22 = vld [vmem:[%s2227_s12 + $0xbc] sm:$0x1] }
  0x35   : > { %1989 = vmatmul.mubr.msk.bf16.gmra.mxu0 %vm324_vm0, %v1791_v25  ;;  %v1088_v39 = vrot.slane %v1086_v27, 5  ;;  %v992_v34 = vrot.slane %v991_v28, 4  ;;  %v994_v49 = vshll.u32 %v1737_v52, 16  ;;  %v1033_v37 = vor.u32 %v1032_v43, %v2390_v18  ;;  %v1751_v52 = vld [vmem:[%s2227_s12 + $0xcc] sm:$0x1] }
  0x36   : > { %2008 = vmatprep.mubr.msk.bf16.mxu0 %vm324_vm0, %v2137_v7  ;;  %v1006_v54 = vrot.slane %v1005_v38, 4  ;;  %v1008_v1 = vshll.u32 %v1739_v48, 16  ;;  %v1047_v56 = vor.u32 %v1046_v10, %v1043_v63  ;;  %v1061_v58 = vor.u32 %v1060_v21, %v1057_v13  ;;  %v2141_v7 = vld [vmem:[%s2609_s1 + $0x60] sm:$0xff]   ;;  %v1745_v21 = vld [vmem:[%s2227_s12 + $0xb4] sm:$0x1] }
  0x37   : > { %v996_v3 = vrot.slane %v994_v49, 5  ;;  %v1020_v15 = vrot.slane %v1019_v33, 4  ;;  %v1022_v17 = vshll.u32 %v1741_v53, 16  ;;  %v1034_v57 = vrot.slane %v1033_v37, 4 }
  0x38   : > { %v1010_v61 = vrot.slane %v1008_v1, 5  ;;  %v1036_v40 = vshll.u32 %v1743_v55, 16  ;;  %v1075_v4 = vor.u32 %v1074_v29, %v1071_v31  ;;  %v1089_v10 = vor.u32 %v1088_v39, %v1085_v32  ;;  %v1749_v29 = vld [vmem:[%s2227_s12 + $0xc4] sm:$0x1]  ;;  %v2144_v39 = vld [vmem:[%s2609_s1 + $0x70] sm:$0xff]   ;;  %v2146_v1 = vld [vmem:[%s2609_s1 + $0x88] sm:$0xff]  }
  0x39   : > { %v997_v18 = vsel %vm2328_vm3, %v992_v34, %v996_v3  ;;  %v1024_v43 = vrot.slane %v1022_v17, 5  ;;  %v1048_v24 = vrot.slane %v1047_v56, 4  ;;  %v1062_v25 = vrot.slane %v1061_v58, 4  ;;  %v2142_v56 = vld [vmem:[%s2227_s12 + $0x108] ss:$8 sps:$4 sm:$0xff]  }
  0x3a   : > { %v1011_v63 = vsel %vm2328_vm3, %v1006_v54, %v1010_v61  ;;  %v1038_v5 = vrot.slane %v1036_v40, 5  ;;  %v1050_v27 = vshll.u32 %v1745_v21, 16  ;;  %v1064_v28 = vshll.u32 %v1747_v22, 16  ;;  %v245_v61 = vld [vmem:[%s2227_s12 + $0x40] sm:$0xf]  ;;  %v1587_v22 = vld [vmem:[%s2611_s3 + $0x18] sm:$0xff] }
  0x3b   : > { %v1830_v13 = vcombine.low %v997_v18, %v1011_v63  ;;  %v1025_v20 = vsel %vm2328_vm3, %v1020_v15, %v1024_v43  ;;  %v1076_v38 = vrot.slane %v1075_v4, 4  ;;  %v1078_v33 = vshll.u32 %v1749_v29, 16  ;;  %v246_v40 = vld [vmem:[%s2227_s12 + $0x44] sm:$0x1] }
  0x3c   : > { %v1039_v31 = vsel %vm2328_vm3, %v1034_v57, %v1038_v5  ;;  %v1052_v48 = vrot.slane %v1050_v27, 5  ;;  %v1066_v34 = vrot.slane %v1064_v28, 5  ;;  %v1090_v49 = vrot.slane %v1089_v10, 4  ;;  %v1593_v5 = vld [vmem:[%s2611_s3 + $0x48] sm:$0xff]  ;;  %v1591_v10 = vld [vmem:[%s2611_s3 + $0x38] sm:$0xff]  ;;  %v1588_v21 = vld [vmem:[%s2611_s3 + $0x20] sm:$0xff] }
  0x3d   : > { %2009 = vmatmul.mubr.msk.bf16.vlgmr.msra.gmra.mxu0 %vm324_vm0, %v2139_v60  ;;  %2020 = vmatprep.mubr.msk.bf16.mxu1 %vm324_vm0, %v1830_v13  ;;  %v1831_v32 = vcombine.low %v1025_v20, %v1039_v31  ;;  %v1092_v37 = vshll.u32 %v1751_v52, 16  ;;  %v1080_v54 = vrot.slane %v1078_v33, 5  ;;  %v1844_v15 = vcombine.low %v2250_v16, %v2253_v19  ;;  %v1590_v13 = vld [vmem:[%s2611_s3 + $0x30] sm:$0xff]  ;;  %v1589_v20 = vld [vmem:[%s2611_s3 + $0x28] sm:$0xff]  ;;  %v1584_v31 = vld [vmem:[%s2611_s3] sm:$0xff] }
  0x3e   : > { %2029 = vmatpush3.bf16.msra.mxu0 %v2382_v14  ;;  %2012 = vmatprep.mubr.msk.bf16.mxu0 %vm324_vm0, %v2140_v62  ;;  %v1053_v53 = vsel %vm2328_vm3, %v1048_v24, %v1052_v48  ;;  %v1067_v14 = vsel %vm2328_vm3, %v1062_v25, %v1066_v34  ;;  %v1845_v16 = vcombine.low %v2260_v23, %v2281_v36  ;;  %v1427_v23 = vshrl.u32 %v245_v61, 16  ;;  %v1586_v24 = vld [vmem:[%s2611_s3 + $0x10] sm:$0xff]  ;;  %v1585_v25 = vld [vmem:[%s2611_s3 + $0x8] sm:$0xff] }
  0x3f   : > { %2021 = vmatmul.mubr.msk.bf16.vlgmr.msra.gmra.mxu1 %vm324_vm0, %v1831_v32  ;;  %2030 = vmatprep.subr.bf16.mxu0 %v2141_v7  ;;  %v1094_v55 = vrot.slane %v1092_v37, 5  ;;  %v1832_v58 = vcombine.low %v1053_v53, %v1067_v14  ;;  %v1081_v60 = vsel %vm2328_vm3, %v1076_v38, %v1080_v54  ;;  %v1846_v19 = vcombine.low %v2288_v41, %v2299_v47 }
  0x40   : > { %2041 = vmatpush3.bf16.msra.mxu1 %v2400_v26  ;;  %v1858_v26 = vcombine.low %v2231_v8, %v2234_v9  ;;  %v1859_v57 = vcombine.low %v2240_v11, %v2243_v12  ;;  %v2148_v8 = vld [vmem:[%s2609_s1 + $0x80] sm:$0xff]   ;;  %v1860_v9 = vcombine.low %v2271_v30, %v2291_v42  ;;  %v1430_v36 = vshll.u32 %v245_v61, 16  ;;  %v1735_v11 = vld [vmem:[%s2227_s12 + $0x88] sm:$0xf] }
  0x41   : > { %2042 = vmatprep.subr.bf16.mxu1 %v2144_v39  ;;  %v1095_v3 = vsel %vm2328_vm3, %v1090_v49, %v1094_v55  ;;  %2024 = vmatprep.mubr.msk.bf16.mxu1 %vm324_vm0, %v1832_v58  ;;  %v1847_v12 = vcombine.low %v2304_v51, %v245_v61  ;;  %v1429_v41 = vrot.slane %v1427_v23, 4  ;;  %v1872_v30 = vcombine.low %v2343_v35, %v2353_v44 }
  0x42   : > { %2031 = vmatpush3.bf16.msra.mxu0 %v2141_v7  ;;  %v1833_v17 = vcombine.low %v1081_v60, %v1095_v3  ;;  %v1432_v47 = vrot.slane %v1430_v36, 5  ;;  %v1861_v42 = vcombine.low %v2296_v46, %v1735_v11  ;;  %v1436_v18 = vshll.u32 %v246_v40, 16  ;;  %v1592_v7 = vld [vmem:[%s2611_s3 + $0x40] sm:$0xff] }
  0x43   : > { %2052 = vmatprep.subr.bf16.mxu0 %v2146_v1  ;;  %v1873_v51 = vcombine.low %v2357_v45, %v2410_v0  ;;  %v1874_v43 = vcombine.low %v2416_v2, %v2427_v50  ;;  %v2160_v44 = vmov 0.0   ;;  %v1599_v45 = vld [vmem:[%s2611_s3 + $0x78] sm:$0xff]  ;;  %v1598_v0 = vld [vmem:[%s2611_s3 + $0x70] sm:$0xff]  ;;  %v1596_v2 = vld [vmem:[%s2611_s3 + $0x60] sm:$0xff] }
  0x44   : > { %2043 = vmatpush3.bf16.msra.mxu1 %v2144_v39  ;;  %v1433_v62 = vor.u32 %v1432_v47, %v1429_v41  ;;  %v1438_v63 = vrot.slane %v1436_v18, 5  ;;  %v1595_v50 = vld [vmem:[%s2611_s3 + $0x58] sm:$0xff] }
  0x45   : > { %2013 = vmatmul.mubr.msk.bf16.gmra.mxu0 %vm324_vm0, %v2142_v56  ;;  %2064 = vmatprep.subr.mxu1 %v2160_v44 }
  0x46   : > { %2032 = vmatprep.mubr.msk.bf16.mxu0 %vm324_vm0, %v1844_v15  ;;  %v1434_v4 = vrot.slane %v1433_v62, 4 }
  0x47   : > { %2025 = vmatmul.mubr.msk.bf16.gmra.mxu1 %vm324_vm0, %v1833_v17 }
  0x48   : > { %2044 = vmatprep.mubr.msk.bf16.mxu1 %vm324_vm0, %v1858_v26  ;;  %v1439_v46 = vsel %vm2328_vm3, %v1434_v4, %v1438_v63 }
  0x49   : > { %v1875_v35 = vcombine.low %v2431_v59, %v1439_v46  ;;  %v1594_v59 = vld [vmem:[%s2611_s3 + $0x50] sm:$0xff] }
  0x4d   : > { %2033 = vmatmul.mubr.msk.bf16.vlgmr.msra.gmra.mxu0 %vm324_vm0, %v1845_v16 }
  0x4e   : > { %2053 = vmatpush3.bf16.msra.mxu0 %v2146_v1  ;;  %2036 = vmatprep.mubr.msk.bf16.mxu0 %vm324_vm0, %v1846_v19 }
  0x4f   : > { %2045 = vmatmul.mubr.msk.bf16.vlgmr.msra.gmra.mxu1 %vm324_vm0, %v1859_v57  ;;  %2054 = vmatprep.subr.bf16.mxu0 %v2148_v8 }
  0x50   : > { %2048 = vmatprep.mubr.msk.bf16.mxu1 %vm324_vm0, %v1860_v9  ;;  %2065 = vmatpush3.msra.mxu1 %v1599_v45 }
  0x51   : > { %2066 = vmatprep.subr.mxu1 %v2160_v44 }
  0x52   : > { %2055 = vmatpush3.bf16.msra.mxu0 %v2148_v8  ;;  %2067 = vmatpush3.msra.mxu1 %v1598_v0 }
  0x53   : > { %2068 = vmatprep.subr.mxu1 %v2160_v44 }
  0x54   : > { %2069 = vmatpush3.msra.mxu1 %v1597_v6 }
  0x55   : > { %2037 = vmatmul.mubr.msk.bf16.gmra.mxu0 %vm324_vm0, %v1847_v12  ;;  %2070 = vmatprep.subr.mxu1 %v2160_v44 }
  0x56   : > { %2056 = vmatprep.mubr.msk.bf16.mxu0 %vm324_vm0, %v1872_v30  ;;  %2071 = vmatpush3.msra.mxu1 %v1596_v2 }
  0x57   : > { %2049 = vmatmul.mubr.msk.bf16.gmra.mxu1 %vm324_vm0, %v1861_v42  ;;  %2072 = vmatprep.subr.mxu1 %v2160_v44 }
  0x58   : > { %2073 = vmatpush3.msra.mxu1 %v1595_v50  ;;  %2096 = vmatprep.mubr.msk.f32.mxu1 %vm2161_vm4, %v2160_v44 }
  0x59   : > { %2074 = vmatprep.subr.mxu1 %v2160_v44 }
  0x5a   : > { %2075 = vmatpush3.msra.mxu1 %v1594_v59 }
  0x5b   : > { %2076 = vmatprep.subr.mxu1 %v2160_v44 }
  0x5c   : > { %2077 = vmatpush3.msra.mxu1 %v1593_v5 }
  0x5d   : > { %2057 = vmatmul.mubr.msk.bf16.vlgmr.msra.gmra.mxu0 %vm324_vm0, %v1873_v51  ;;  %2078 = vmatprep.subr.mxu1 %v2160_v44 }
  0x5e   : > { %2060 = vmatprep.mubr.msk.bf16.mxu0 %vm324_vm0, %v1874_v43  ;;  %2079 = vmatpush3.msra.mxu1 %v1592_v7 }
  0x5f   : > { %2080 = vmatprep.subr.mxu1 %v2160_v44 }
  0x60   : > { %2081 = vmatpush3.msra.mxu1 %v1591_v10 }
  0x61   : > { %2082 = vmatprep.subr.mxu1 %v2160_v44 }
  0x62   : > { %2083 = vmatpush3.msra.mxu1 %v1590_v13 }
  0x63   : > { %2084 = vmatprep.subr.mxu1 %v2160_v44 }
  0x64   : > { %2085 = vmatpush3.msra.mxu1 %v1589_v20 }
  0x65   : > { %2061 = vmatmul.mubr.msk.bf16.gmra.mxu0 %vm324_vm0, %v1875_v35  ;;  %2086 = vmatprep.subr.mxu1 %v2160_v44 }
  0x66   : > { %2087 = vmatpush3.msra.mxu1 %v1588_v21 }
  0x67   : > { %2088 = vmatprep.subr.mxu1 %v2160_v44 }
  0x68   : > { %2089 = vmatpush3.msra.mxu1 %v1587_v22 }
  0x69   : > { %2090 = vmatprep.subr.mxu1 %v2160_v44 }
  0x6a   : > { %2091 = vmatpush3.msra.mxu1 %v1586_v24 }
  0x6b   : > { %2092 = vmatprep.subr.mxu1 %v2160_v44 }
  0x6c   : > { %2093 = vmatpush3.msra.mxu1 %v1585_v25 }
  0x6d   : > { %2094 = vmatprep.subr.mxu1 %v2160_v44 }
  0x6e   : > { %2095 = vmatpush3.msra.mxu1 %v1584_v31 }
  0xd8   : > { %v1962_v27 = vpop.f32.mrf.mxu0 }
  0xda   : > { %v1974_v28 = vpop.f32.mrf.mxu1  ;;  %v371_v29 = vpop.f32.mrf.mxu0 }
  0xdb   : > { %v489_v6 = vadd.f32 %v1974_v28, %v1962_v27 }
  0xdc   : > { %v480_v52 = vpop.f32.mrf.mxu1  ;;  %v1963_v32 = vpop.f32.mrf.mxu0 }
  0xdd   : > { %v481_v44 = vadd.f32 %v480_v52, %v371_v29 }
  0xde   : > { %v1975_v38 = vpop.f32.mrf.mxu1  ;;  %v374_v33 = vpop.f32.mrf.mxu0 }
  0xdf   : > { %v492_v5 = vadd.f32 %v1975_v38, %v1963_v32 }
  0xe0   : > { %v483_v39 = vpop.f32.mrf.mxu1  ;;  %v1966_v48 = vpop.f32.mrf.mxu0 }
  0xe1   : > { %v484_v7 = vadd.f32 %v483_v39, %v374_v33 }
  0xe2   : > { %v1978_v34 = vpop.f32.mrf.mxu1  ;;  %v387_v49 = vpop.f32.mrf.mxu0 }
  0xe3   : > { %v505_v52 = vadd.f32 %v1978_v34, %v1966_v48 }
  0xe4   : > { %v496_v37 = vpop.f32.mrf.mxu1  ;;  %v1967_v54 = vpop.f32.mrf.mxu0 }
  0xe6   : > { %v1979_v1 = vpop.f32.mrf.mxu1  ;;  %v390_v53 = vpop.f32.mrf.mxu0 }
  0xe7   : > { %v508_v32 = vadd.f32 %v1979_v1, %v1967_v54 }
  0xe8   : > { %v499_v14 = vpop.f32.mrf.mxu1  ;;  %v1986_v55 = vpop.f32.mrf.mxu0 }
  0xe9   : > { %v734_v10 = vadd.f32 %v1986_v55, %v489_v6  ;;  %v500_v38 = vadd.f32 %v499_v14, %v390_v53 }
  0xea   : > { %v1998_v56 = vpop.f32.mrf.mxu1  ;;  %v701_v58 = vpop.f32.mrf.mxu0 }
  0xeb   : > { %v732_v2 = vadd.f32 %v701_v58, %v481_v44 }
  0xec   : > { %v823_v60 = vpop.f32.mrf.mxu1  ;;  %v1987_v3 = vpop.f32.mrf.mxu0 }
  0xed   : > { %v735_v21 = vadd.f32 %v1987_v3, %v492_v5  ;;  %v854_v22 = vadd.f32 %v823_v60, %v732_v2 }
  0xee   : > { %v1999_v15 = vpop.f32.mrf.mxu1  ;;  %v704_v26 = vpop.f32.mrf.mxu0 }
  0xef   : > { %v733_v24 = vadd.f32 %v704_v26, %v484_v7 }
  0xf0   : > { %v826_v17 = vpop.f32.mrf.mxu1 }
  0xf1   : > { %v855_v27 = vadd.f32 %v826_v17, %v733_v24 }
  0xf2   : > { %v2579_v16 = vpop.f32.mrf.mxu1 }
  0xf4   : > { %v839_v19 = vpop.f32.mrf.mxu1 }
  0xf5   : > { %v1990_v57 = vpop.f32.mrf.mxu0 }
  0xf6   : > { %v2581_v9 = vpop.f32.mrf.mxu1  ;;  %v738_v33 = vadd.f32 %v1990_v57, %v505_v52 }
  0xf7   : > { %v717_v8 = vpop.f32.mrf.mxu0 }
  0xf8   : > { %v2583_v36 = vpop.f32.mrf.mxu1  ;;  %v860_v34 = vadd.f32 %v2579_v16, %v738_v33 }
  0xf9   : > { %v1991_v61 = vpop.f32.mrf.mxu0  ;;  %2616 = vst [vmem:[#allocation3_spill] sm:$0xff] %v2583_v36  ;;  %v857_v36 = vadd.f32 %v1999_v15, %v735_v21 }
  0xfa   : > { %v739_v26 = vadd.f32 %v1991_v61, %v508_v32 }
  0xfb   : > { %v720_v23 = vpop.f32.mrf.mxu0 }
  0xfc   : > { %v737_v6 = vadd.f32 %v720_v23, %v500_v38  ;;  %v861_v1 = vadd.f32 %v2581_v9, %v739_v26 }
  0xfd   : > { %v2010_v11 = vpop.f32.mrf.mxu0 }
  0xff   : > { %v945_v12 = vpop.f32.mrf.mxu0  ;;  %v2022_v41 = vpop.f32.mrf.mxu1 }
 0x100   : > { %v976_v29 = vadd.f32 %v945_v12, %v854_v22  ;;  %v2620_v53 = vld [vmem:[#allocation3_spill] sm:$0xff] }
 0x101   : > { %v2011_v47 = vpop.f32.mrf.mxu0  ;;  %v1171_v30 = vpop.f32.mrf.mxu1  ;;  %v859_v14 = vadd.f32 %v2620_v53, %v737_v6 }
 0x102   : > { %v979_v55 = vadd.f32 %v2011_v47, %v857_v36  ;;  %v1202_v3 = vadd.f32 %v1171_v30, %v976_v29 }
 0x103   : > { %v948_v42 = vpop.f32.mrf.mxu0  ;;  %v2023_v40 = vpop.f32.mrf.mxu1 }
 0x104   : > { %v977_v60 = vadd.f32 %v948_v42, %v855_v27  ;;  %v1205_v17 = vadd.f32 %v2023_v40, %v979_v55 }
 0x105   : > { %v2014_v62 = vpop.f32.mrf.mxu0  ;;  %v1174_v18 = vpop.f32.mrf.mxu1 }
 0x106   : > { %v982_v57 = vadd.f32 %v2014_v62, %v860_v34 }
 0x107   : > { %v961_v51 = vpop.f32.mrf.mxu0  ;;  %v2585_v43 = vpop.f32.mrf.mxu1 }
 0x108   : > { %2617 = vst [vmem:[#allocation4_spill] sm:$0xff] %v2585_v43  ;;  %v497_v43 = vadd.f32 %v496_v37, %v387_v49 }
 0x109   : > { %v2015_v4 = vpop.f32.mrf.mxu0  ;;  %v1187_v63 = vpop.f32.mrf.mxu1 }
 0x10a   : > { %v736_v28 = vadd.f32 %v717_v8, %v497_v43  ;;  %v1203_v8 = vadd.f32 %v1174_v18, %v977_v60 }
 0x10b   : > { %v964_v46 = vpop.f32.mrf.mxu0  ;;  %v2587_v35 = vpop.f32.mrf.mxu1 }
 0x10c   : > { %2618 = vst [vmem:[#allocation5_spill] sm:$0xff] %v2587_v35  ;;  %v856_v35 = vadd.f32 %v1998_v56, %v734_v10  ;;  %v858_v49 = vadd.f32 %v839_v19, %v736_v28  ;;  %v981_v47 = vadd.f32 %v964_v46, %v859_v14 }
 0x10d   : > { %v2589_v45 = vpop.f32.mrf.mxu1  ;;  %v2034_v0 = vpop.f32.mrf.mxu0 }
 0x10e   : > { %2619 = vst [vmem:[#allocation6_spill] sm:$0xff] %v2589_v45  ;;  %v978_v58 = vadd.f32 %v2010_v11, %v856_v35  ;;  %v980_v11 = vadd.f32 %v961_v51, %v858_v49 }
 0x10f   : > { %v1279_v50 = vpop.f32.mrf.mxu0  ;;  %v2046_v59 = vpop.f32.mrf.mxu1  ;;  %v2621_v40 = vld [vmem:[#allocation4_spill] sm:$0xff] }
 0x110   : > { %v1204_v37 = vadd.f32 %v2022_v41, %v978_v58  ;;  %v1310_v56 = vadd.f32 %v1279_v50, %v1202_v3  ;;  %v983_v41 = vadd.f32 %v2015_v4, %v861_v1  ;;  %v1206_v42 = vadd.f32 %v1187_v63, %v980_v11  ;;  %v1882_v4 = vld [vmem:[%s2610_s2] ss:$0 sm:$0xff] }
 0x111   : > { %v2035_v13 = vpop.f32.mrf.mxu0  ;;  %v1387_v20 = vpop.f32.mrf.mxu1  ;;  %v1208_v18 = vadd.f32 %v2621_v40, %v982_v57 }
 0x112   : > { %v1312_v54 = vadd.f32 %v2034_v0, %v1204_v37  ;;  %v1313_v61 = vadd.f32 %v2035_v13, %v1205_v17  ;;  %v1418_v23 = vadd.f32 %v1387_v20, %v1310_v56 }
 0x113   : > { %v1282_v25 = vpop.f32.mrf.mxu0  ;;  %v2047_v31 = vpop.f32.mrf.mxu1  ;;  %v2622_v62 = vld [vmem:[#allocation5_spill] sm:$0xff] }
 0x114   : > { %v1311_v12 = vadd.f32 %v1282_v25, %v1203_v8  ;;  %v1420_v16 = vadd.f32 %v2046_v59, %v1312_v54  ;;  %v1421_v35 = vadd.f32 %v2047_v31, %v1313_v61  ;;  %v1209_v7 = vadd.f32 %v2622_v62, %v983_v41 }
 0x115   : > { %v2038_v45 = vpop.f32.mrf.mxu0  ;;  %v1390_v44 = vpop.f32.mrf.mxu1  ;;  %v2623_v10 = vld [vmem:[#allocation6_spill] sm:$0xff] }
 0x116   : > { %v1419_v0 = vadd.f32 %v1390_v44, %v1311_v12  ;;  %v1207_v13 = vadd.f32 %v2623_v10, %v981_v47  ;;  %v1316_v20 = vadd.f32 %v2038_v45, %v1208_v18 }
 0x117   : > { %v1295_v39 = vpop.f32.mrf.mxu0  ;;  %v2050_v48 = vpop.f32.mrf.mxu1 }
 0x118   : > { %v1314_v9 = vadd.f32 %v1295_v39, %v1206_v42  ;;  %v1424_v28 = vadd.f32 %v2050_v48, %v1316_v20 }
 0x119   : > { %v2039_v2 = vpop.f32.mrf.mxu0  ;;  %v1403_v19 = vpop.f32.mrf.mxu1 }
 0x11a   : > { %v1317_v22 = vadd.f32 %v2039_v2, %v1209_v7  ;;  %v1422_v31 = vadd.f32 %v1403_v19, %v1314_v9 }
 0x11b   : > { %v1298_v15 = vpop.f32.mrf.mxu0  ;;  %v2051_v50 = vpop.f32.mrf.mxu1 }
 0x11c   : > { %v1315_v24 = vadd.f32 %v1298_v15, %v1207_v13  ;;  %v1425_v33 = vadd.f32 %v2051_v50, %v1317_v22 }
 0x11d   : > { %v2058_v36 = vpop.f32.mrf.mxu0  ;;  %v1406_v29 = vpop.f32.mrf.mxu1 }
 0x11e   : > { %v1541_v5 = vadd.f32 %v2058_v36, %v1420_v16  ;;  %v1423_v39 = vadd.f32 %v1406_v29, %v1315_v24  ;;  %v1600_v16 = vld [vmem:[#allocation2] sm:$0x1] }
 0x11f   : > { %v1508_v30 = vpop.f32.mrf.mxu0 }
 0x120   : > { %v1539_v43 = vadd.f32 %v1508_v30, %v1418_v23  ;;  %v1556_v52 = vadd.f32 %v1882_v4, %v1541_v5 }
 0x121   : > { %v2059_v51 = vpop.f32.mrf.mxu0 }
 0x122   : > { %v1554_v46 = vadd.f32 %v1882_v4, %v1539_v43  ;;  %v1542_v59 = vadd.f32 %v2059_v51, %v1421_v35  ;;  %v1564_v3 = vmax.f32 %v1556_v52, 0.0 }
 0x123   : > { %v1511_v63 = vpop.f32.mrf.mxu0 }
 0x124   : > { %v1540_v21 = vadd.f32 %v1511_v63, %v1419_v0  ;;  %v1562_v44 = vmax.f32 %v1554_v46, 0.0  ;;  %v1557_v32 = vadd.f32 %v1882_v4, %v1542_v59 }
 0x125   : > { %v2062_v25 = vpop.f32.mrf.mxu0 }
 0x126   : > { %v1555_v27 = vadd.f32 %v1882_v4, %v1540_v21  ;;  %v1545_v26 = vadd.f32 %v2062_v25, %v1424_v28  ;;  %v1565_v49 = vmax.f32 %v1557_v32, 0.0 }
 0x127   : > { %v1524_v58 = vpop.f32.mrf.mxu0 }
 0x128   : > { %v1563_v45 = vmax.f32 %v1555_v27, 0.0  ;;  %v1543_v38 = vadd.f32 %v1524_v58, %v1422_v31  ;;  %v1560_v15 = vadd.f32 %v1882_v4, %v1545_v26 }
 0x129   : > { %v2063_v55 = vpop.f32.mrf.mxu0 }
 0x12a   : > { %v1570_v60 = vadd.f32 %v1563_v45, %v1562_v44  ;;  %v1558_v6 = vadd.f32 %v1882_v4, %v1543_v38  ;;  %v1546_v56 = vadd.f32 %v2063_v55, %v1425_v33  ;;  %v1568_v53 = vmax.f32 %v1560_v15, 0.0 }
 0x12b   : > { %v1527_v2 = vpop.f32.mrf.mxu0 }
 0x12c   : > { %v1571_v37 = vadd.f32 %v1570_v60, %v1564_v3  ;;  %v1544_v34 = vadd.f32 %v1527_v2, %v1423_v39  ;;  %v1566_v17 = vmax.f32 %v1558_v6, 0.0  ;;  %v1561_v54 = vadd.f32 %v1882_v4, %v1546_v56 }
 0x12e   : > { %v1572_v48 = vadd.f32 %v1571_v37, %v1565_v49  ;;  %v1559_v8 = vadd.f32 %v1882_v4, %v1544_v34  ;;  %v1569_v57 = vmax.f32 %v1561_v54, 0.0 }
 0x130   : > { %v1573_v11 = vadd.f32 %v1572_v48, %v1566_v17  ;;  %v1567_v1 = vmax.f32 %v1559_v8, 0.0 }
 0x132   : > { %v1574_v14 = vadd.f32 %v1573_v11, %v1567_v1 }
 0x134   : > { %v1575_v36 = vadd.f32 %v1574_v14, %v1568_v53 }
 0x136   : > { %v1576_v61 = vadd.f32 %v1575_v36, %v1569_v57 }
 0x138   : > { %v1577_v23 = vrot.slane %v1576_v61, 4 }
 0x13a   : > { %v1578_v12 = vadd.f32 %v1577_v23, %v1576_v61 }
 0x13c   : > { %v1579_v19 = vrot.slane %v1578_v12, 2 }
 0x13e   : > { %v1580_v41 = vadd.f32 %v1579_v19, %v1578_v12 }
 0x140   : > { %v1581_v47 = vrot.slane %v1580_v41, 1 }
 0x142   : > { %v1582_v30 = vadd.f32 %v1581_v47, %v1580_v41 }
 0x144   : > { %v1583_v42 = vmul.f32 0.015625, %v1582_v30 }
 0x146   : > { %2097 = vmatmul.mubr.f32.vlgmr.msra.gmra.mxu1 %v1583_v42 }
 0x206   : > { %v1667_v43 = vpop.f32.mrf.mxu1 }
 0x207   : > { %v1668_v40 = vadd.f32 %v1667_v43, %v1600_v16 }
 0x208   : > { %v2098_v18 = vpop.f32.mrf.mxu1 }
 0x209   : > { %1672 = vst.msk [vmem:[%s227_s26] sm:$0x1] %vm1671_vm5, %v1668_v40 }
 0x20a PF: > { %s17_s20 = sadd.s32 1, %s2158_s20  }
 0x20b   : > { %p14_p5 = scmp.ge.s32.totalorder %s17_s20, 4  }
 0x20d   :  { %16 = sbr.rel (!%p14_p5) target bundleno = 3 (0x3), region = 81 }

</bundles_post_ra>
